<compile_context>
chip_gen: v7x
topology: tpu7x:2x2x1
jax: 0.10.0
libtpu: 0.0.40
codegen_flags: <defaults>
</compile_context>

<pallas_src>
import functools

import jax
import jax.numpy as jnp
from jax.experimental import pallas as pl
from jax.experimental.pallas import tpu as pltpu

H = 64             # conv out channels == LSTM hidden size
BATCH_PAD = 8      # batch padded to the 8-sublane tile

VMEM_SPEC = pl.BlockSpec(memory_space=pltpu.MemorySpace.VMEM)


def fused_cnn_lstm_kernel(xs_ref, wc_ref, bc_ref,
                          wih_f_ref, whh_f_ref, bf_ref,
                          wih_r_ref, br_ref,
                          w1f_ref, w1b_ref, b1_ref, w2_ref, b2_ref,
                          out_ref, gx_ref, *, Bp, T):
    f32 = jnp.float32
    bf16 = jnp.bfloat16
    R = T * Bp

    # ---- Conv1d(k=3,pad=1) + ReLU + MaxPool1d(2,2) --------------------------
    # Wrapper stacks (t,b)-ordered k=3 windows for even and odd sequence
    # positions along rows, so the conv+ReLU is ONE matmul and the pool one max
    # of the two sublane-aligned row halves.
    y = jnp.maximum(
        jnp.dot(xs_ref[...], wc_ref[...], preferred_element_type=f32) + bc_ref[...],
        0.0)                                               # (2*T*Bp, 64)
    pooled = jnp.maximum(y[0:R, :], y[R:2 * R, :])         # (T*Bp, 64), time-major

    # Mask selecting the low 64 lanes of a 128-lane gate group (hoisted).
    low64 = jax.lax.broadcasted_iota(jnp.int32, (Bp, 2 * H), 1) < H

    # ---- forward LSTM --------------------------------------------------------
    # Input projection hoisted out of the recurrence as one matmul (bf16 in,
    # f32 out).  Gate column layout: [i | f | g | o] at 64-lane offsets.
    gx_ref[...] = (jnp.dot(pooled.astype(bf16), wih_f_ref[...],
                           preferred_element_type=f32) + bf_ref[...])  # (T*Bp, 256)
    whh = whh_f_ref[...]                                   # (64, 256) bf16

    def cell(g, c):
        # g: (Bp, 256) f32 gates; c: (Bp, 128) f32 laid out as [c | 0].
        gA = g[:, 0:2 * H]                                 # [i | f]  (aligned slice)
        gB = g[:, 2 * H:4 * H]                             # [g | o]
        sA = jax.nn.sigmoid(gA)                            # [sig i | sig f]
        aB = jnp.where(low64, jnp.tanh(gB), jax.nn.sigmoid(gB))   # [tanh g | sig o]
        ig = jnp.where(low64, sA * aB, 0.0)                # [sig i * tanh g | 0]
        c2 = pltpu.roll(sA, shift=H, axis=1) * c + ig      # [c' | 0]
        h2 = pltpu.roll(aB, shift=H, axis=1) * jnp.tanh(c2)  # [h' | 0]
        return h2[:, 0:H], c2                              # offset-0 slice -> (Bp,64)

    def step(t, carry):
        h, c = carry
        r0 = pl.multiple_of(t * Bp, 8)                     # contiguous aligned rows
        g = gx_ref[pl.ds(r0, Bp), :] + jnp.dot(h.astype(bf16), whh,
                                               preferred_element_type=f32)
        return cell(g, c)

    h0 = jnp.zeros((Bp, H), f32)
    c0 = jnp.zeros((Bp, 2 * H), f32)
    h_fwd, _ = jax.lax.fori_loop(0, T, step, (h0, c0), unroll=True)

    # ---- reverse direction ---------------------------------------------------
    # output[:, -1, H:2H] of a bidirectional LSTM depends only on x[T-1] with a
    # zero initial state, so one cell step reproduces it exactly; with c0 = 0
    # the forget gate is irrelevant, so wih_r carries only [i | g | o] (N=192).
    # Do NOT "fix" this into a full reverse scan unless other time positions
    # are consumed.
    x_last = pooled[(T - 1) * Bp:T * Bp, :].astype(bf16)              # (Bp, 64)
    g_r = (jnp.dot(x_last, wih_r_ref[...], preferred_element_type=f32)
           + br_ref[...])                                             # (Bp, 192)
    gA_r = g_r[:, 0:2 * H]                                            # [i | g]
    o_r = jax.nn.sigmoid(g_r[:, 2 * H:3 * H])                         # (Bp, 64)
    aA_r = jnp.where(low64, jax.nn.sigmoid(gA_r), jnp.tanh(gA_r))     # [sig i | tanh g]
    c_r = aA_r * pltpu.roll(aA_r, shift=H, axis=1)                    # both halves = sig i * tanh g
    h_bwd = o_r * jnp.tanh(c_r[:, 0:H])                               # (Bp, 64)

    # ---- head ----------------------------------------------------------------
    # TODO(synk): Dropout(0.3) (and the LSTM's dropout=0.2, a no-op for a single
    # layer) are identity in eval mode; no PRNG masking implemented.
    # fc1 split into fwd/bwd halves so no lane concat of h_fwd/h_bwd is needed.
    hfc = jnp.maximum(
        jnp.dot(h_fwd.astype(bf16), w1f_ref[...], preferred_element_type=f32)
        + jnp.dot(h_bwd.astype(bf16), w1b_ref[...], preferred_element_type=f32)
        + b1_ref[...], 0.0)                                           # (Bp, 32)
    out_ref[...] = (jnp.dot(hfc.astype(bf16), w2_ref[...],
                            preferred_element_type=f32) + b2_ref[...])


def cnn_lstm_forward(x, params):
    B, S, Cin = x.shape
    assert S % 2 == 0, "MaxPool1d(2,2) pairing assumes an even sequence length"
    T = S // 2
    Bp = max(BATCH_PAD, ((B + BATCH_PAD - 1) // BATCH_PAD) * BATCH_PAD)

    # Pad batch to a sublane multiple; padded rows never mix with real rows
    # (no cross-batch op anywhere) and are sliced off at the end.
    xb = jnp.pad(x, ((0, Bp - B), (0, 0), (0, 0)))
    xp = jnp.pad(xb, ((0, 0), (1, 1), (0, 0)))                        # Conv1d padding=1
    # k=3 windows, channel-concat order [t-1 | t | t+1].
    xwin = jnp.concatenate([xp[:, 0:S], xp[:, 1:S + 1], xp[:, 2:S + 2]], axis=-1)
    # Time-major (t, b) row order; even windows stacked on top of odd windows so
    # the conv is one matmul and the pool one max of the two row halves.
    x_even = jnp.transpose(xwin[:, 0::2, :], (1, 0, 2)).reshape(T * Bp, 3 * Cin)
    x_odd = jnp.transpose(xwin[:, 1::2, :], (1, 0, 2)).reshape(T * Bp, 3 * Cin)
    x_stack = jnp.concatenate([x_even, x_odd], axis=0)                # (2*T*Bp, 3*Cin)

    kernel = functools.partial(fused_cnn_lstm_kernel, Bp=Bp, T=T)
    out = pl.pallas_call(
        kernel,
        out_shape=jax.ShapeDtypeStruct((Bp, 3), jnp.float32),
        in_specs=[VMEM_SPEC] * 13,
        out_specs=VMEM_SPEC,
        scratch_shapes=[pltpu.VMEM((T * Bp, 4 * H), jnp.float32)],
    )(x_stack,
      params["conv_w"], params["conv_b"],
      params["wih_f"], params["whh_f"], params["b_f"],
      params["wih_r"], params["b_r"],
      params["fc1_wf"], params["fc1_wb"], params["fc1_b"],
      params["fc2_w"], params["fc2_b"])
    return out[:B]


def init_params(key, input_dim):
    ks = jax.random.split(key, 11)

    def u(k, shape, scale):
        return jax.random.uniform(k, shape, jnp.float32, -scale, scale)

    conv_scale = 1.0 / (input_dim * 3) ** 0.5
    lstm_scale = 1.0 / H ** 0.5

    # Logical weights (input-major layouts, PyTorch gate order [i, f, g, o]).
    # When importing real PyTorch weights: sum bias_ih + bias_hh into b_f/b_r,
    # permute conv weight (Cout,Cin,k) -> (k,Cin,Cout) before the reshape, and
    # transpose every (out,in) Linear/LSTM weight to input-major.
    conv_w = u(ks[0], (3, input_dim, H), conv_scale)       # (k, Cin, Cout)
    conv_b = u(ks[1], (1, H), conv_scale)
    wih_f = u(ks[2], (H, 4 * H), lstm_scale)
    whh_f = u(ks[3], (H, 4 * H), lstm_scale)
    b_f = u(ks[4], (1, 4 * H), lstm_scale)                 # bias_ih + bias_hh combined
    wih_r = u(ks[5], (H, 4 * H), lstm_scale)               # reverse dir: W_hh unused
    b_r = u(ks[6], (1, 4 * H), lstm_scale)                 # (single step from zero state)
    fc1_w = u(ks[7], (2 * H, 32), 1.0 / (2 * H) ** 0.5)
    fc1_b = u(ks[8], (1, 32), 1.0 / (2 * H) ** 0.5)
    fc2_w = u(ks[9], (32, 3), 1.0 / 32 ** 0.5)
    fc2_b = u(ks[10], (1, 3), 1.0 / 32 ** 0.5)

    def igo(w):
        # Keep only the [i, g, o] gate blocks: the forget gate never matters
        # for the single reverse-direction step taken from a zero cell state.
        return jnp.concatenate(
            [w[..., 0:H], w[..., 2 * H:3 * H], w[..., 3 * H:4 * H]], axis=-1)

    bf16 = jnp.bfloat16
    return {
        # rows ordered k*Cin + cin to match the [t-1|t|t+1] channel-concat windows
        "conv_w": conv_w.reshape(3 * input_dim, H),        # (3*Cin, 64) f32
        "conv_b": conv_b,                                  # (1, 64)    f32
        "wih_f": wih_f.astype(bf16),                       # (64, 256)  bf16
        "whh_f": whh_f.astype(bf16),                       # (64, 256)  bf16
        "b_f": b_f,                                        # (1, 256)   f32
        "wih_r": igo(wih_r).astype(bf16),                  # (64, 192)  bf16
        "b_r": igo(b_r),                                   # (1, 192)   f32
        "fc1_wf": fc1_w[:H].astype(bf16),                  # (64, 32)   bf16
        "fc1_wb": fc1_w[H:].astype(bf16),                  # (64, 32)   bf16
        "fc1_b": fc1_b,                                    # (1, 32)    f32
        "fc2_w": fc2_w.astype(bf16),                       # (32, 3)    bf16
        "fc2_b": fc2_b,                                    # (1, 3)     f32
    }


if __name__ == "__main__":
    key = jax.random.PRNGKey(0)
    kx, kp = jax.random.split(key)

    batch, seq_len, input_dim = 2, 16, 8
    x = jax.random.normal(kx, (batch, seq_len, input_dim), jnp.float32)
    params = init_params(kp, input_dim)

    out = jax.jit(cnn_lstm_forward)(x, params)
    out = jax.block_until_ready(out)
    assert out.shape == (batch, 3), out.shape
    assert bool(jnp.all(jnp.isfinite(out)))
    print("KERNEL_OK")
</pallas_src>

<mosaic_0001>
module attributes {stable_mosaic.version = 11 : i64} {
  func.func @fused_cnn_lstm_kernel(%arg0: memref<128x24xf32, #tpu.memory_space<vmem>>, %arg1: memref<24x64xf32, #tpu.memory_space<vmem>>, %arg2: memref<1x64xf32, #tpu.memory_space<vmem>>, %arg3: memref<64x256xbf16, #tpu.memory_space<vmem>>, %arg4: memref<64x256xbf16, #tpu.memory_space<vmem>>, %arg5: memref<1x256xf32, #tpu.memory_space<vmem>>, %arg6: memref<64x192xbf16, #tpu.memory_space<vmem>>, %arg7: memref<1x192xf32, #tpu.memory_space<vmem>>, %arg8: memref<64x32xbf16, #tpu.memory_space<vmem>>, %arg9: memref<64x32xbf16, #tpu.memory_space<vmem>>, %arg10: memref<1x32xf32, #tpu.memory_space<vmem>>, %arg11: memref<32x3xbf16, #tpu.memory_space<vmem>>, %arg12: memref<1x3xf32, #tpu.memory_space<vmem>>, %arg13: memref<8x3xf32, #tpu.memory_space<vmem>>, %arg14: memref<64x256xf32, #tpu.memory_space<vmem>>) attributes {dimension_semantics = [], scalar_prefetch = 0 : i64, scratch_operands = 1 : i64, tpu.core_type = #tpu.core_type<tc>} {
    %c0 = arith.constant 0 : index
    %c0_0 = arith.constant 0 : index
    %0 = vector.load %arg0[%c0, %c0_0] : memref<128x24xf32, #tpu.memory_space<vmem>>, vector<128x24xf32>
    %c0_1 = arith.constant 0 : index
    %c0_2 = arith.constant 0 : index
    %1 = vector.load %arg1[%c0_1, %c0_2] : memref<24x64xf32, #tpu.memory_space<vmem>>, vector<24x64xf32>
    %cst = arith.constant dense<0.000000e+00> : vector<128x64xf32>
    %2 = tpu.matmul %0, %1, %cst {dimension_numbers = #tpu.dot_dimension_numbers<[1], [0], [0], [1], [0, 0, 1, 1], [], []>} : vector<128x24xf32>, vector<24x64xf32>, vector<128x64xf32> -> vector<128x64xf32>
    %c0_3 = arith.constant 0 : index
    %c0_4 = arith.constant 0 : index
    %3 = vector.load %arg2[%c0_3, %c0_4] : memref<1x64xf32, #tpu.memory_space<vmem>>, vector<1x64xf32>
    %4 = vector.broadcast %3 : vector<1x64xf32> to vector<128x64xf32>
    %5 = arith.addf %2, %4 : vector<128x64xf32>
    %cst_5 = arith.constant 0.000000e+00 : f32
    %6 = vector.broadcast %cst_5 : f32 to vector<128x64xf32>
    %7 = arith.maximumf %5, %6 : vector<128x64xf32>
    %8 = vector.extract_strided_slice %7 {offsets = [0, 0], sizes = [64, 64], strides = [1, 1]} : vector<128x64xf32> to vector<64x64xf32>
    %9 = vector.extract_strided_slice %7 {offsets = [64, 0], sizes = [64, 64], strides = [1, 1]} : vector<128x64xf32> to vector<64x64xf32>
    %10 = arith.maximumf %8, %9 : vector<64x64xf32>
    %11 = tpu.iota {dimensions = array<i32: 1>} : vector<8x128xi32>
    %c64_i32 = arith.constant 64 : i32
    %12 = vector.broadcast %c64_i32 : i32 to vector<8x128xi32>
    %13 = arith.cmpi slt, %11, %12 : vector<8x128xi32>
    %14 = arith.truncf %10 : vector<64x64xf32> to vector<64x64xbf16>
    %c0_6 = arith.constant 0 : index
    %c0_7 = arith.constant 0 : index
    %15 = vector.load %arg3[%c0_6, %c0_7] : memref<64x256xbf16, #tpu.memory_space<vmem>>, vector<64x256xbf16>
    %cst_8 = arith.constant dense<0.000000e+00> : vector<64x256xf32>
    %16 = tpu.matmul %14, %15, %cst_8 {dimension_numbers = #tpu.dot_dimension_numbers<[1], [0], [0], [1], [0, 0, 1, 1], [], []>} : vector<64x64xbf16>, vector<64x256xbf16>, vector<64x256xf32> -> vector<64x256xf32>
    %c0_9 = arith.constant 0 : index
    %c0_10 = arith.constant 0 : index
    %17 = vector.load %arg5[%c0_9, %c0_10] : memref<1x256xf32, #tpu.memory_space<vmem>>, vector<1x256xf32>
    %18 = vector.broadcast %17 : vector<1x256xf32> to vector<64x256xf32>
    %19 = arith.addf %16, %18 : vector<64x256xf32>
    %c0_11 = arith.constant 0 : index
    %c0_12 = arith.constant 0 : index
    %20 = vector.load %arg14[%c0_11, %c0_12] : memref<64x256xf32, #tpu.memory_space<vmem>>, vector<64x256xf32>
    tpu.vector_store %arg14[%c0_11, %c0_12], %19 {strides = array<i32>} : memref<64x256xf32, #tpu.memory_space<vmem>>, vector<64x256xf32>,
    %c0_13 = arith.constant 0 : index
    %c0_14 = arith.constant 0 : index
    %21 = vector.load %arg4[%c0_13, %c0_14] : memref<64x256xbf16, #tpu.memory_space<vmem>>, vector<64x256xbf16>
    %cst_15 = arith.constant 0.000000e+00 : f32
    %22 = vector.broadcast %cst_15 : f32 to vector<8x64xf32>
    %cst_16 = arith.constant 0.000000e+00 : f32
    %23 = vector.broadcast %cst_16 : f32 to vector<8x128xf32>
    %c0_i32 = arith.constant 0 : i32
    %c8_i32 = arith.constant 8 : i32
    %24 = arith.muli %c0_i32, %c8_i32 : i32
    %25 = tpu.assume_multiple %24, 8 : i32
    %26 = arith.index_cast %25 : i32 to index
    %c0_17 = arith.constant 0 : index
    %27 = vector.load %arg14[%26, %c0_17] : memref<64x256xf32, #tpu.memory_space<vmem>>, vector<8x256xf32>
    %28 = arith.truncf %22 : vector<8x64xf32> to vector<8x64xbf16>
    %cst_18 = arith.constant dense<0.000000e+00> : vector<8x256xf32>
    %29 = tpu.matmul %28, %21, %cst_18 {dimension_numbers = #tpu.dot_dimension_numbers<[1], [0], [0], [1], [0, 0, 1, 1], [], []>} : vector<8x64xbf16>, vector<64x256xbf16>, vector<8x256xf32> -> vector<8x256xf32>
    %30 = arith.addf %27, %29 : vector<8x256xf32>
    %31 = vector.extract_strided_slice %30 {offsets = [0, 0], sizes = [8, 128], strides = [1, 1]} : vector<8x256xf32> to vector<8x128xf32>
    %32 = vector.extract_strided_slice %30 {offsets = [0, 128], sizes = [8, 128], strides = [1, 1]} : vector<8x256xf32> to vector<8x128xf32>
    %33 = arith.negf %31 : vector<8x128xf32>
    %34 = math.exp %33 : vector<8x128xf32>
    %cst_19 = arith.constant 1.000000e+00 : f32
    %35 = vector.broadcast %cst_19 : f32 to vector<8x128xf32>
    %36 = arith.addf %35, %34 : vector<8x128xf32>
    %37 = arith.divf %35, %36 : vector<8x128xf32>
    %38 = math.tanh %32 : vector<8x128xf32>
    %39 = arith.negf %32 : vector<8x128xf32>
    %40 = math.exp %39 : vector<8x128xf32>
    %cst_20 = arith.constant 1.000000e+00 : f32
    %41 = vector.broadcast %cst_20 : f32 to vector<8x128xf32>
    %42 = arith.addf %41, %40 : vector<8x128xf32>
    %43 = arith.divf %41, %42 : vector<8x128xf32>
    %44 = arith.select %13, %38, %43 : vector<8x128xi1>, vector<8x128xf32>
    %45 = arith.mulf %37, %44 : vector<8x128xf32>
    %cst_21 = arith.constant 0.000000e+00 : f32
    %46 = vector.broadcast %cst_21 : f32 to vector<8x128xf32>
    %47 = arith.select %13, %45, %46 : vector<8x128xi1>, vector<8x128xf32>
    %c64_i32_22 = arith.constant 64 : i32
    %48 = tpu.dynamic_rotate %37 by %c64_i32_22 dim 1 : vector<8x128xf32>, i32 -> vector<8x128xf32>
    %49 = arith.mulf %48, %23 : vector<8x128xf32>
    %50 = arith.addf %49, %47 : vector<8x128xf32>
    %c64_i32_23 = arith.constant 64 : i32
    %51 = tpu.dynamic_rotate %44 by %c64_i32_23 dim 1 : vector<8x128xf32>, i32 -> vector<8x128xf32>
    %52 = math.tanh %50 : vector<8x128xf32>
    %53 = arith.mulf %51, %52 : vector<8x128xf32>
    %54 = vector.extract_strided_slice %53 {offsets = [0, 0], sizes = [8, 64], strides = [1, 1]} : vector<8x128xf32> to vector<8x64xf32>
    %c1_i32 = arith.constant 1 : i32
    %c8_i32_24 = arith.constant 8 : i32
    %55 = arith.muli %c1_i32, %c8_i32_24 : i32
    %56 = tpu.assume_multiple %55, 8 : i32
    %57 = arith.index_cast %56 : i32 to index
    %c0_25 = arith.constant 0 : index
    %58 = vector.load %arg14[%57, %c0_25] : memref<64x256xf32, #tpu.memory_space<vmem>>, vector<8x256xf32>
    %59 = arith.truncf %54 : vector<8x64xf32> to vector<8x64xbf16>
    %cst_26 = arith.constant dense<0.000000e+00> : vector<8x256xf32>
    %60 = tpu.matmul %59, %21, %cst_26 {dimension_numbers = #tpu.dot_dimension_numbers<[1], [0], [0], [1], [0, 0, 1, 1], [], []>} : vector<8x64xbf16>, vector<64x256xbf16>, vector<8x256xf32> -> vector<8x256xf32>
    %61 = arith.addf %58, %60 : vector<8x256xf32>
    %62 = vector.extract_strided_slice %61 {offsets = [0, 0], sizes = [8, 128], strides = [1, 1]} : vector<8x256xf32> to vector<8x128xf32>
    %63 = vector.extract_strided_slice %61 {offsets = [0, 128], sizes = [8, 128], strides = [1, 1]} : vector<8x256xf32> to vector<8x128xf32>
    %64 = arith.negf %62 : vector<8x128xf32>
    %65 = math.exp %64 : vector<8x128xf32>
    %cst_27 = arith.constant 1.000000e+00 : f32
    %66 = vector.broadcast %cst_27 : f32 to vector<8x128xf32>
    %67 = arith.addf %66, %65 : vector<8x128xf32>
    %68 = arith.divf %66, %67 : vector<8x128xf32>
    %69 = math.tanh %63 : vector<8x128xf32>
    %70 = arith.negf %63 : vector<8x128xf32>
    %71 = math.exp %70 : vector<8x128xf32>
    %cst_28 = arith.constant 1.000000e+00 : f32
    %72 = vector.broadcast %cst_28 : f32 to vector<8x128xf32>
    %73 = arith.addf %72, %71 : vector<8x128xf32>
    %74 = arith.divf %72, %73 : vector<8x128xf32>
    %75 = arith.select %13, %69, %74 : vector<8x128xi1>, vector<8x128xf32>
    %76 = arith.mulf %68, %75 : vector<8x128xf32>
    %cst_29 = arith.constant 0.000000e+00 : f32
    %77 = vector.broadcast %cst_29 : f32 to vector<8x128xf32>
    %78 = arith.select %13, %76, %77 : vector<8x128xi1>, vector<8x128xf32>
    %c64_i32_30 = arith.constant 64 : i32
    %79 = tpu.dynamic_rotate %68 by %c64_i32_30 dim 1 : vector<8x128xf32>, i32 -> vector<8x128xf32>
    %80 = arith.mulf %79, %50 : vector<8x128xf32>
    %81 = arith.addf %80, %78 : vector<8x128xf32>
    %c64_i32_31 = arith.constant 64 : i32
    %82 = tpu.dynamic_rotate %75 by %c64_i32_31 dim 1 : vector<8x128xf32>, i32 -> vector<8x128xf32>
    %83 = math.tanh %81 : vector<8x128xf32>
    %84 = arith.mulf %82, %83 : vector<8x128xf32>
    %85 = vector.extract_strided_slice %84 {offsets = [0, 0], sizes = [8, 64], strides = [1, 1]} : vector<8x128xf32> to vector<8x64xf32>
    %c2_i32 = arith.constant 2 : i32
    %c8_i32_32 = arith.constant 8 : i32
    %86 = arith.muli %c2_i32, %c8_i32_32 : i32
    %87 = tpu.assume_multiple %86, 8 : i32
    %88 = arith.index_cast %87 : i32 to index
    %c0_33 = arith.constant 0 : index
    %89 = vector.load %arg14[%88, %c0_33] : memref<64x256xf32, #tpu.memory_space<vmem>>, vector<8x256xf32>
    %90 = arith.truncf %85 : vector<8x64xf32> to vector<8x64xbf16>
    %cst_34 = arith.constant dense<0.000000e+00> : vector<8x256xf32>
    %91 = tpu.matmul %90, %21, %cst_34 {dimension_numbers = #tpu.dot_dimension_numbers<[1], [0], [0], [1], [0, 0, 1, 1], [], []>} : vector<8x64xbf16>, vector<64x256xbf16>, vector<8x256xf32> -> vector<8x256xf32>
    %92 = arith.addf %89, %91 : vector<8x256xf32>
    %93 = vector.extract_strided_slice %92 {offsets = [0, 0], sizes = [8, 128], strides = [1, 1]} : vector<8x256xf32> to vector<8x128xf32>
    %94 = vector.extract_strided_slice %92 {offsets = [0, 128], sizes = [8, 128], strides = [1, 1]} : vector<8x256xf32> to vector<8x128xf32>
    %95 = arith.negf %93 : vector<8x128xf32>
    %96 = math.exp %95 : vector<8x128xf32>
    %cst_35 = arith.constant 1.000000e+00 : f32
    %97 = vector.broadcast %cst_35 : f32 to vector<8x128xf32>
    %98 = arith.addf %97, %96 : vector<8x128xf32>
    %99 = arith.divf %97, %98 : vector<8x128xf32>
    %100 = math.tanh %94 : vector<8x128xf32>
    %101 = arith.negf %94 : vector<8x128xf32>
    %102 = math.exp %101 : vector<8x128xf32>
    %cst_36 = arith.constant 1.000000e+00 : f32
    %103 = vector.broadcast %cst_36 : f32 to vector<8x128xf32>
    %104 = arith.addf %103, %102 : vector<8x128xf32>
    %105 = arith.divf %103, %104 : vector<8x128xf32>
    %106 = arith.select %13, %100, %105 : vector<8x128xi1>, vector<8x128xf32>
    %107 = arith.mulf %99, %106 : vector<8x128xf32>
    %cst_37 = arith.constant 0.000000e+00 : f32
    %108 = vector.broadcast %cst_37 : f32 to vector<8x128xf32>
    %109 = arith.select %13, %107, %108 : vector<8x128xi1>, vector<8x128xf32>
    %c64_i32_38 = arith.constant 64 : i32
    %110 = tpu.dynamic_rotate %99 by %c64_i32_38 dim 1 : vector<8x128xf32>, i32 -> vector<8x128xf32>
    %111 = arith.mulf %110, %81 : vector<8x128xf32>
    %112 = arith.addf %111, %109 : vector<8x128xf32>
    %c64_i32_39 = arith.constant 64 : i32
    %113 = tpu.dynamic_rotate %106 by %c64_i32_39 dim 1 : vector<8x128xf32>, i32 -> vector<8x128xf32>
    %114 = math.tanh %112 : vector<8x128xf32>
    %115 = arith.mulf %113, %114 : vector<8x128xf32>
    %116 = vector.extract_strided_slice %115 {offsets = [0, 0], sizes = [8, 64], strides = [1, 1]} : vector<8x128xf32> to vector<8x64xf32>
    %c3_i32 = arith.constant 3 : i32
    %c8_i32_40 = arith.constant 8 : i32
    %117 = arith.muli %c3_i32, %c8_i32_40 : i32
    %118 = tpu.assume_multiple %117, 8 : i32
    %119 = arith.index_cast %118 : i32 to index
    %c0_41 = arith.constant 0 : index
    %120 = vector.load %arg14[%119, %c0_41] : memref<64x256xf32, #tpu.memory_space<vmem>>, vector<8x256xf32>
    %121 = arith.truncf %116 : vector<8x64xf32> to vector<8x64xbf16>
    %cst_42 = arith.constant dense<0.000000e+00> : vector<8x256xf32>
    %122 = tpu.matmul %121, %21, %cst_42 {dimension_numbers = #tpu.dot_dimension_numbers<[1], [0], [0], [1], [0, 0, 1, 1], [], []>} : vector<8x64xbf16>, vector<64x256xbf16>, vector<8x256xf32> -> vector<8x256xf32>
    %123 = arith.addf %120, %122 : vector<8x256xf32>
    %124 = vector.extract_strided_slice %123 {offsets = [0, 0], sizes = [8, 128], strides = [1, 1]} : vector<8x256xf32> to vector<8x128xf32>
    %125 = vector.extract_strided_slice %123 {offsets = [0, 128], sizes = [8, 128], strides = [1, 1]} : vector<8x256xf32> to vector<8x128xf32>
    %126 = arith.negf %124 : vector<8x128xf32>
    %127 = math.exp %126 : vector<8x128xf32>
    %cst_43 = arith.constant 1.000000e+00 : f32
    %128 = vector.broadcast %cst_43 : f32 to vector<8x128xf32>
    %129 = arith.addf %128, %127 : vector<8x128xf32>
    %130 = arith.divf %128, %129 : vector<8x128xf32>
    %131 = math.tanh %125 : vector<8x128xf32>
    %132 = arith.negf %125 : vector<8x128xf32>
    %133 = math.exp %132 : vector<8x128xf32>
    %cst_44 = arith.constant 1.000000e+00 : f32
    %134 = vector.broadcast %cst_44 : f32 to vector<8x128xf32>
    %135 = arith.addf %134, %133 : vector<8x128xf32>
    %136 = arith.divf %134, %135 : vector<8x128xf32>
    %137 = arith.select %13, %131, %136 : vector<8x128xi1>, vector<8x128xf32>
    %138 = arith.mulf %130, %137 : vector<8x128xf32>
    %cst_45 = arith.constant 0.000000e+00 : f32
    %139 = vector.broadcast %cst_45 : f32 to vector<8x128xf32>
    %140 = arith.select %13, %138, %139 : vector<8x128xi1>, vector<8x128xf32>
    %c64_i32_46 = arith.constant 64 : i32
    %141 = tpu.dynamic_rotate %130 by %c64_i32_46 dim 1 : vector<8x128xf32>, i32 -> vector<8x128xf32>
    %142 = arith.mulf %141, %112 : vector<8x128xf32>
    %143 = arith.addf %142, %140 : vector<8x128xf32>
    %c64_i32_47 = arith.constant 64 : i32
    %144 = tpu.dynamic_rotate %137 by %c64_i32_47 dim 1 : vector<8x128xf32>, i32 -> vector<8x128xf32>
    %145 = math.tanh %143 : vector<8x128xf32>
    %146 = arith.mulf %144, %145 : vector<8x128xf32>
    %147 = vector.extract_strided_slice %146 {offsets = [0, 0], sizes = [8, 64], strides = [1, 1]} : vector<8x128xf32> to vector<8x64xf32>
    %c4_i32 = arith.constant 4 : i32
    %c8_i32_48 = arith.constant 8 : i32
    %148 = arith.muli %c4_i32, %c8_i32_48 : i32
    %149 = tpu.assume_multiple %148, 8 : i32
    %150 = arith.index_cast %149 : i32 to index
    %c0_49 = arith.constant 0 : index
    %151 = vector.load %arg14[%150, %c0_49] : memref<64x256xf32, #tpu.memory_space<vmem>>, vector<8x256xf32>
    %152 = arith.truncf %147 : vector<8x64xf32> to vector<8x64xbf16>
    %cst_50 = arith.constant dense<0.000000e+00> : vector<8x256xf32>
    %153 = tpu.matmul %152, %21, %cst_50 {dimension_numbers = #tpu.dot_dimension_numbers<[1], [0], [0], [1], [0, 0, 1, 1], [], []>} : vector<8x64xbf16>, vector<64x256xbf16>, vector<8x256xf32> -> vector<8x256xf32>
    %154 = arith.addf %151, %153 : vector<8x256xf32>
    %155 = vector.extract_strided_slice %154 {offsets = [0, 0], sizes = [8, 128], strides = [1, 1]} : vector<8x256xf32> to vector<8x128xf32>
    %156 = vector.extract_strided_slice %154 {offsets = [0, 128], sizes = [8, 128], strides = [1, 1]} : vector<8x256xf32> to vector<8x128xf32>
    %157 = arith.negf %155 : vector<8x128xf32>
    %158 = math.exp %157 : vector<8x128xf32>
    %cst_51 = arith.constant 1.000000e+00 : f32
    %159 = vector.broadcast %cst_51 : f32 to vector<8x128xf32>
    %160 = arith.addf %159, %158 : vector<8x128xf32>
    %161 = arith.divf %159, %160 : vector<8x128xf32>
    %162 = math.tanh %156 : vector<8x128xf32>
    %163 = arith.negf %156 : vector<8x128xf32>
    %164 = math.exp %163 : vector<8x128xf32>
    %cst_52 = arith.constant 1.000000e+00 : f32
    %165 = vector.broadcast %cst_52 : f32 to vector<8x128xf32>
    %166 = arith.addf %165, %164 : vector<8x128xf32>
    %167 = arith.divf %165, %166 : vector<8x128xf32>
    %168 = arith.select %13, %162, %167 : vector<8x128xi1>, vector<8x128xf32>
    %169 = arith.mulf %161, %168 : vector<8x128xf32>
    %cst_53 = arith.constant 0.000000e+00 : f32
    %170 = vector.broadcast %cst_53 : f32 to vector<8x128xf32>
    %171 = arith.select %13, %169, %170 : vector<8x128xi1>, vector<8x128xf32>
    %c64_i32_54 = arith.constant 64 : i32
    %172 = tpu.dynamic_rotate %161 by %c64_i32_54 dim 1 : vector<8x128xf32>, i32 -> vector<8x128xf32>
    %173 = arith.mulf %172, %143 : vector<8x128xf32>
    %174 = arith.addf %173, %171 : vector<8x128xf32>
    %c64_i32_55 = arith.constant 64 : i32
    %175 = tpu.dynamic_rotate %168 by %c64_i32_55 dim 1 : vector<8x128xf32>, i32 -> vector<8x128xf32>
    %176 = math.tanh %174 : vector<8x128xf32>
    %177 = arith.mulf %175, %176 : vector<8x128xf32>
    %178 = vector.extract_strided_slice %177 {offsets = [0, 0], sizes = [8, 64], strides = [1, 1]} : vector<8x128xf32> to vector<8x64xf32>
    %c5_i32 = arith.constant 5 : i32
    %c8_i32_56 = arith.constant 8 : i32
    %179 = arith.muli %c5_i32, %c8_i32_56 : i32
    %180 = tpu.assume_multiple %179, 8 : i32
    %181 = arith.index_cast %180 : i32 to index
    %c0_57 = arith.constant 0 : index
    %182 = vector.load %arg14[%181, %c0_57] : memref<64x256xf32, #tpu.memory_space<vmem>>, vector<8x256xf32>
    %183 = arith.truncf %178 : vector<8x64xf32> to vector<8x64xbf16>
    %cst_58 = arith.constant dense<0.000000e+00> : vector<8x256xf32>
    %184 = tpu.matmul %183, %21, %cst_58 {dimension_numbers = #tpu.dot_dimension_numbers<[1], [0], [0], [1], [0, 0, 1, 1], [], []>} : vector<8x64xbf16>, vector<64x256xbf16>, vector<8x256xf32> -> vector<8x256xf32>
    %185 = arith.addf %182, %184 : vector<8x256xf32>
    %186 = vector.extract_strided_slice %185 {offsets = [0, 0], sizes = [8, 128], strides = [1, 1]} : vector<8x256xf32> to vector<8x128xf32>
    %187 = vector.extract_strided_slice %185 {offsets = [0, 128], sizes = [8, 128], strides = [1, 1]} : vector<8x256xf32> to vector<8x128xf32>
    %188 = arith.negf %186 : vector<8x128xf32>
    %189 = math.exp %188 : vector<8x128xf32>
    %cst_59 = arith.constant 1.000000e+00 : f32
    %190 = vector.broadcast %cst_59 : f32 to vector<8x128xf32>
    %191 = arith.addf %190, %189 : vector<8x128xf32>
    %192 = arith.divf %190, %191 : vector<8x128xf32>
    %193 = math.tanh %187 : vector<8x128xf32>
    %194 = arith.negf %187 : vector<8x128xf32>
    %195 = math.exp %194 : vector<8x128xf32>
    %cst_60 = arith.constant 1.000000e+00 : f32
    %196 = vector.broadcast %cst_60 : f32 to vector<8x128xf32>
    %197 = arith.addf %196, %195 : vector<8x128xf32>
    %198 = arith.divf %196, %197 : vector<8x128xf32>
    %199 = arith.select %13, %193, %198 : vector<8x128xi1>, vector<8x128xf32>
    %200 = arith.mulf %192, %199 : vector<8x128xf32>
    %cst_61 = arith.constant 0.000000e+00 : f32
    %201 = vector.broadcast %cst_61 : f32 to vector<8x128xf32>
    %202 = arith.select %13, %200, %201 : vector<8x128xi1>, vector<8x128xf32>
    %c64_i32_62 = arith.constant 64 : i32
    %203 = tpu.dynamic_rotate %192 by %c64_i32_62 dim 1 : vector<8x128xf32>, i32 -> vector<8x128xf32>
    %204 = arith.mulf %203, %174 : vector<8x128xf32>
    %205 = arith.addf %204, %202 : vector<8x128xf32>
    %c64_i32_63 = arith.constant 64 : i32
    %206 = tpu.dynamic_rotate %199 by %c64_i32_63 dim 1 : vector<8x128xf32>, i32 -> vector<8x128xf32>
    %207 = math.tanh %205 : vector<8x128xf32>
    %208 = arith.mulf %206, %207 : vector<8x128xf32>
    %209 = vector.extract_strided_slice %208 {offsets = [0, 0], sizes = [8, 64], strides = [1, 1]} : vector<8x128xf32> to vector<8x64xf32>
    %c6_i32 = arith.constant 6 : i32
    %c8_i32_64 = arith.constant 8 : i32
    %210 = arith.muli %c6_i32, %c8_i32_64 : i32
    %211 = tpu.assume_multiple %210, 8 : i32
    %212 = arith.index_cast %211 : i32 to index
    %c0_65 = arith.constant 0 : index
    %213 = vector.load %arg14[%212, %c0_65] : memref<64x256xf32, #tpu.memory_space<vmem>>, vector<8x256xf32>
    %214 = arith.truncf %209 : vector<8x64xf32> to vector<8x64xbf16>
    %cst_66 = arith.constant dense<0.000000e+00> : vector<8x256xf32>
    %215 = tpu.matmul %214, %21, %cst_66 {dimension_numbers = #tpu.dot_dimension_numbers<[1], [0], [0], [1], [0, 0, 1, 1], [], []>} : vector<8x64xbf16>, vector<64x256xbf16>, vector<8x256xf32> -> vector<8x256xf32>
    %216 = arith.addf %213, %215 : vector<8x256xf32>
    %217 = vector.extract_strided_slice %216 {offsets = [0, 0], sizes = [8, 128], strides = [1, 1]} : vector<8x256xf32> to vector<8x128xf32>
    %218 = vector.extract_strided_slice %216 {offsets = [0, 128], sizes = [8, 128], strides = [1, 1]} : vector<8x256xf32> to vector<8x128xf32>
    %219 = arith.negf %217 : vector<8x128xf32>
    %220 = math.exp %219 : vector<8x128xf32>
    %cst_67 = arith.constant 1.000000e+00 : f32
    %221 = vector.broadcast %cst_67 : f32 to vector<8x128xf32>
    %222 = arith.addf %221, %220 : vector<8x128xf32>
    %223 = arith.divf %221, %222 : vector<8x128xf32>
    %224 = math.tanh %218 : vector<8x128xf32>
    %225 = arith.negf %218 : vector<8x128xf32>
    %226 = math.exp %225 : vector<8x128xf32>
    %cst_68 = arith.constant 1.000000e+00 : f32
    %227 = vector.broadcast %cst_68 : f32 to vector<8x128xf32>
    %228 = arith.addf %227, %226 : vector<8x128xf32>
    %229 = arith.divf %227, %228 : vector<8x128xf32>
    %230 = arith.select %13, %224, %229 : vector<8x128xi1>, vector<8x128xf32>
    %231 = arith.mulf %223, %230 : vector<8x128xf32>
    %cst_69 = arith.constant 0.000000e+00 : f32
    %232 = vector.broadcast %cst_69 : f32 to vector<8x128xf32>
    %233 = arith.select %13, %231, %232 : vector<8x128xi1>, vector<8x128xf32>
    %c64_i32_70 = arith.constant 64 : i32
    %234 = tpu.dynamic_rotate %223 by %c64_i32_70 dim 1 : vector<8x128xf32>, i32 -> vector<8x128xf32>
    %235 = arith.mulf %234, %205 : vector<8x128xf32>
    %236 = arith.addf %235, %233 : vector<8x128xf32>
    %c64_i32_71 = arith.constant 64 : i32
    %237 = tpu.dynamic_rotate %230 by %c64_i32_71 dim 1 : vector<8x128xf32>, i32 -> vector<8x128xf32>
    %238 = math.tanh %236 : vector<8x128xf32>
    %239 = arith.mulf %237, %238 : vector<8x128xf32>
    %240 = vector.extract_strided_slice %239 {offsets = [0, 0], sizes = [8, 64], strides = [1, 1]} : vector<8x128xf32> to vector<8x64xf32>
    %c7_i32 = arith.constant 7 : i32
    %c8_i32_72 = arith.constant 8 : i32
    %241 = arith.muli %c7_i32, %c8_i32_72 : i32
    %242 = tpu.assume_multiple %241, 8 : i32
    %243 = arith.index_cast %242 : i32 to index
    %c0_73 = arith.constant 0 : index
    %244 = vector.load %arg14[%243, %c0_73] : memref<64x256xf32, #tpu.memory_space<vmem>>, vector<8x256xf32>
    %245 = arith.truncf %240 : vector<8x64xf32> to vector<8x64xbf16>
    %cst_74 = arith.constant dense<0.000000e+00> : vector<8x256xf32>
    %246 = tpu.matmul %245, %21, %cst_74 {dimension_numbers = #tpu.dot_dimension_numbers<[1], [0], [0], [1], [0, 0, 1, 1], [], []>} : vector<8x64xbf16>, vector<64x256xbf16>, vector<8x256xf32> -> vector<8x256xf32>
    %247 = arith.addf %244, %246 : vector<8x256xf32>
    %248 = vector.extract_strided_slice %247 {offsets = [0, 0], sizes = [8, 128], strides = [1, 1]} : vector<8x256xf32> to vector<8x128xf32>
    %249 = vector.extract_strided_slice %247 {offsets = [0, 128], sizes = [8, 128], strides = [1, 1]} : vector<8x256xf32> to vector<8x128xf32>
    %250 = arith.negf %248 : vector<8x128xf32>
    %251 = math.exp %250 : vector<8x128xf32>
    %cst_75 = arith.constant 1.000000e+00 : f32
    %252 = vector.broadcast %cst_75 : f32 to vector<8x128xf32>
    %253 = arith.addf %252, %251 : vector<8x128xf32>
    %254 = arith.divf %252, %253 : vector<8x128xf32>
    %255 = math.tanh %249 : vector<8x128xf32>
    %256 = arith.negf %249 : vector<8x128xf32>
    %257 = math.exp %256 : vector<8x128xf32>
    %cst_76 = arith.constant 1.000000e+00 : f32
    %258 = vector.broadcast %cst_76 : f32 to vector<8x128xf32>
    %259 = arith.addf %258, %257 : vector<8x128xf32>
    %260 = arith.divf %258, %259 : vector<8x128xf32>
    %261 = arith.select %13, %255, %260 : vector<8x128xi1>, vector<8x128xf32>
    %262 = arith.mulf %254, %261 : vector<8x128xf32>
    %cst_77 = arith.constant 0.000000e+00 : f32
    %263 = vector.broadcast %cst_77 : f32 to vector<8x128xf32>
    %264 = arith.select %13, %262, %263 : vector<8x128xi1>, vector<8x128xf32>
    %c64_i32_78 = arith.constant 64 : i32
    %265 = tpu.dynamic_rotate %254 by %c64_i32_78 dim 1 : vector<8x128xf32>, i32 -> vector<8x128xf32>
    %266 = arith.mulf %265, %236 : vector<8x128xf32>
    %267 = arith.addf %266, %264 : vector<8x128xf32>
    %c64_i32_79 = arith.constant 64 : i32
    %268 = tpu.dynamic_rotate %261 by %c64_i32_79 dim 1 : vector<8x128xf32>, i32 -> vector<8x128xf32>
    %269 = math.tanh %267 : vector<8x128xf32>
    %270 = arith.mulf %268, %269 : vector<8x128xf32>
    %271 = vector.extract_strided_slice %270 {offsets = [0, 0], sizes = [8, 64], strides = [1, 1]} : vector<8x128xf32> to vector<8x64xf32>
    %c8_i32_80 = arith.constant 8 : i32
    %272 = vector.extract_strided_slice %10 {offsets = [56, 0], sizes = [8, 64], strides = [1, 1]} : vector<64x64xf32> to vector<8x64xf32>
    %273 = arith.truncf %272 : vector<8x64xf32> to vector<8x64xbf16>
    %c0_81 = arith.constant 0 : index
    %c0_82 = arith.constant 0 : index
    %274 = vector.load %arg6[%c0_81, %c0_82] : memref<64x192xbf16, #tpu.memory_space<vmem>>, vector<64x192xbf16>
    %cst_83 = arith.constant dense<0.000000e+00> : vector<8x192xf32>
    %275 = tpu.matmul %273, %274, %cst_83 {dimension_numbers = #tpu.dot_dimension_numbers<[1], [0], [0], [1], [0, 0, 1, 1], [], []>} : vector<8x64xbf16>, vector<64x192xbf16>, vector<8x192xf32> -> vector<8x192xf32>
    %c0_84 = arith.constant 0 : index
    %c0_85 = arith.constant 0 : index
    %276 = vector.load %arg7[%c0_84, %c0_85] : memref<1x192xf32, #tpu.memory_space<vmem>>, vector<1x192xf32>
    %277 = vector.broadcast %276 : vector<1x192xf32> to vector<8x192xf32>
    %278 = arith.addf %275, %277 : vector<8x192xf32>
    %279 = vector.extract_strided_slice %278 {offsets = [0, 0], sizes = [8, 128], strides = [1, 1]} : vector<8x192xf32> to vector<8x128xf32>
    %280 = vector.extract_strided_slice %278 {offsets = [0, 128], sizes = [8, 64], strides = [1, 1]} : vector<8x192xf32> to vector<8x64xf32>
    %281 = arith.negf %280 : vector<8x64xf32>
    %282 = math.exp %281 : vector<8x64xf32>
    %cst_86 = arith.constant 1.000000e+00 : f32
    %283 = vector.broadcast %cst_86 : f32 to vector<8x64xf32>
    %284 = arith.addf %283, %282 : vector<8x64xf32>
    %285 = arith.divf %283, %284 : vector<8x64xf32>
    %286 = arith.negf %279 : vector<8x128xf32>
    %287 = math.exp %286 : vector<8x128xf32>
    %cst_87 = arith.constant 1.000000e+00 : f32
    %288 = vector.broadcast %cst_87 : f32 to vector<8x128xf32>
    %289 = arith.addf %288, %287 : vector<8x128xf32>
    %290 = arith.divf %288, %289 : vector<8x128xf32>
    %291 = math.tanh %279 : vector<8x128xf32>
    %292 = arith.select %13, %290, %291 : vector<8x128xi1>, vector<8x128xf32>
    %c64_i32_88 = arith.constant 64 : i32
    %293 = tpu.dynamic_rotate %292 by %c64_i32_88 dim 1 : vector<8x128xf32>, i32 -> vector<8x128xf32>
    %294 = arith.mulf %292, %293 : vector<8x128xf32>
    %295 = vector.extract_strided_slice %294 {offsets = [0, 0], sizes = [8, 64], strides = [1, 1]} : vector<8x128xf32> to vector<8x64xf32>
    %296 = math.tanh %295 : vector<8x64xf32>
    %297 = arith.mulf %285, %296 : vector<8x64xf32>
    %298 = arith.truncf %271 : vector<8x64xf32> to vector<8x64xbf16>
    %c0_89 = arith.constant 0 : index
    %c0_90 = arith.constant 0 : index
    %299 = vector.load %arg8[%c0_89, %c0_90] : memref<64x32xbf16, #tpu.memory_space<vmem>>, vector<64x32xbf16>
    %cst_91 = arith.constant dense<0.000000e+00> : vector<8x32xf32>
    %300 = tpu.matmul %298, %299, %cst_91 {dimension_numbers = #tpu.dot_dimension_numbers<[1], [0], [0], [1], [0, 0, 1, 1], [], []>} : vector<8x64xbf16>, vector<64x32xbf16>, vector<8x32xf32> -> vector<8x32xf32>
    %301 = arith.truncf %297 : vector<8x64xf32> to vector<8x64xbf16>
    %c0_92 = arith.constant 0 : index
    %c0_93 = arith.constant 0 : index
    %302 = vector.load %arg9[%c0_92, %c0_93] : memref<64x32xbf16, #tpu.memory_space<vmem>>, vector<64x32xbf16>
    %cst_94 = arith.constant dense<0.000000e+00> : vector<8x32xf32>
    %303 = tpu.matmul %301, %302, %cst_94 {dimension_numbers = #tpu.dot_dimension_numbers<[1], [0], [0], [1], [0, 0, 1, 1], [], []>} : vector<8x64xbf16>, vector<64x32xbf16>, vector<8x32xf32> -> vector<8x32xf32>
    %304 = arith.addf %300, %303 : vector<8x32xf32>
    %c0_95 = arith.constant 0 : index
    %c0_96 = arith.constant 0 : index
    %305 = vector.load %arg10[%c0_95, %c0_96] : memref<1x32xf32, #tpu.memory_space<vmem>>, vector<1x32xf32>
    %306 = vector.broadcast %305 : vector<1x32xf32> to vector<8x32xf32>
    %307 = arith.addf %304, %306 : vector<8x32xf32>
    %cst_97 = arith.constant 0.000000e+00 : f32
    %308 = vector.broadcast %cst_97 : f32 to vector<8x32xf32>
    %309 = arith.maximumf %307, %308 : vector<8x32xf32>
    %310 = arith.truncf %309 : vector<8x32xf32> to vector<8x32xbf16>
    %c0_98 = arith.constant 0 : index
    %c0_99 = arith.constant 0 : index
    %311 = vector.load %arg11[%c0_98, %c0_99] : memref<32x3xbf16, #tpu.memory_space<vmem>>, vector<32x3xbf16>
    %cst_100 = arith.constant dense<0.000000e+00> : vector<8x3xf32>
    %312 = tpu.matmul %310, %311, %cst_100 {dimension_numbers = #tpu.dot_dimension_numbers<[1], [0], [0], [1], [0, 0, 1, 1], [], []>} : vector<8x32xbf16>, vector<32x3xbf16>, vector<8x3xf32> -> vector<8x3xf32>
    %c0_101 = arith.constant 0 : index
    %c0_102 = arith.constant 0 : index
    %313 = vector.load %arg12[%c0_101, %c0_102] : memref<1x3xf32, #tpu.memory_space<vmem>>, vector<1x3xf32>
    %314 = vector.broadcast %313 : vector<1x3xf32> to vector<8x3xf32>
    %315 = arith.addf %312, %314 : vector<8x3xf32>
    %c0_103 = arith.constant 0 : index
    %c0_104 = arith.constant 0 : index
    %316 = vector.load %arg13[%c0_103, %c0_104] : memref<8x3xf32, #tpu.memory_space<vmem>>, vector<8x3xf32>
    tpu.vector_store %arg13[%c0_103, %c0_104], %315 {strides = array<i32>} : memref<8x3xf32, #tpu.memory_space<vmem>>, vector<8x3xf32>,
    return
  }
}

</mosaic_0001>

<bundles_post_ra>
// kernel: cnn_lstm_forward.1
= control target key start
LH: loop header
LB: loop body
LE: loop exit
PB: predicated region body
PF: predicated region fallthrough
CT: control target
= control target key end

     0   :  { %vm71_vm0 = vcmask 195584   ;;  %v1821_v36 = vmov 0   ;;  %vm356_vm1 = vcmask 523264   ;;  %vm1824_vm3 = vmmov 0   ;;  %s2333_s1 = inlined_call_operand.vmem [shape: f32[24,64], index: 1, kind: input, shape index: {}]   ;;  %s2334_s0 = inlined_call_operand.vmem [shape: f32[128,24], index: 0, kind: input, shape index: {}]   ;;  %s2335_s4 = inlined_call_operand.vmem [shape: bf16[64,256], index: 4, kind: input, shape index: {}]   ;;  %s2336_s3 = inlined_call_operand.vmem [shape: bf16[64,256], index: 3, kind: input, shape index: {}]   ;;  %s2337_s2 = inlined_call_operand.vmem [shape: f32[1,64], index: 2, kind: input, shape index: {}]   ;;  %s2338_s5 = inlined_call_operand.vmem [shape: f32[1,256], index: 5, kind: input, shape index: {}]   ;;  %s2339_s6 = inlined_call_operand.vmem [shape: bf16[64,192], index: 6, kind: input, shape index: {}]   ;;  %s2340_s7 = inlined_call_operand.vmem [shape: f32[1,192], index: 7, kind: input, shape index: {}]   ;;  %s2341_s9 = inlined_call_operand.vmem [shape: bf16[64,32], index: 9, kind: input, shape index: {}]   ;;  %s2342_s8 = inlined_call_operand.vmem [shape: bf16[64,32], index: 8, kind: input, shape index: {}]   ;;  %s2343_s11 = inlined_call_operand.vmem [shape: bf16[32,3], index: 11, kind: input, shape index: {}]   ;;  %s2344_s10 = inlined_call_operand.vmem [shape: f32[1,32], index: 10, kind: input, shape index: {}]   ;;  %s2345_s12 = inlined_call_operand.vmem [shape: f32[1,3], index: 12, kind: input, shape index: {}]   ;;  %s2346_s13 = inlined_call_operand.vmem [shape: f32[8,3], index: 13, kind: output, shape index: {}]  }
   0x1   :  { %v61_v0 = vld [vmem:[%s2333_s1] sm:$0xff]  ;;  %v62_v1 = vld [vmem:[%s2333_s1 + $0x8] sm:$0xff]  ;;  %v63_v4 = vld [vmem:[%s2333_s1 + $0x10] sm:$0xff]  ;;  %401 = vmatprep.mubr.bf16.mxu1 %v1821_v36  ;;  %vm1422_vm4 = vcmask 261120   ;;  %vm1466_vm5 = vcmask 23552  }
   0x2   :  { %v1659_v2 = vpack.c.bf16 %v62_v1, %v61_v0  ;;  %v45_v3 = vld [vmem:[%s2334_s0] sm:$0xff]  ;;  %v46_v5 = vld [vmem:[%s2334_s0 + $0x8] sm:$0xff]  ;;  %v47_v6 = vld [vmem:[%s2334_s0 + $0x10] sm:$0xff] }
   0x3   :  { %1603 = vmatprep.mubr.msk.f32.mxu0 %vm71_vm0, %v45_v3  ;;  %v1917_v7 = vld [vmem:[%s2335_s4 + $0x4] ss:$8 sps:$4 sm:$0xff]   ;;  %v1922_v8 = vld [vmem:[%s2335_s4] ss:$8 sps:$4 sm:$0xff]   ;;  %v48_v9 = vld [vmem:[%s2334_s0 + $0x18] sm:$0xff] }
   0x4   :  { %1660 = vmatprep.subr.bf16.mxu0 %v1659_v2  ;;  %v49_v10 = vld [vmem:[%s2334_s0 + $0x20] sm:$0xff]  ;;  %v50_v11 = vld [vmem:[%s2334_s0 + $0x28] sm:$0xff]  ;;  %v51_v12 = vld [vmem:[%s2334_s0 + $0x30] sm:$0xff] }
   0x5   :  { %1662 = vmatpush3.bf16.msra.mxu0 %v1659_v2  ;;  %v52_v13 = vld [vmem:[%s2334_s0 + $0x38] sm:$0xff]  ;;  %v53_v14 = vld [vmem:[%s2334_s0 + $0x40] sm:$0xff]  ;;  %v54_v15 = vld [vmem:[%s2334_s0 + $0x48] sm:$0xff] }
   0x6   :  { %1601 = vmatprep.subr.mxu0 %v63_v4  ;;  %v55_v16 = vld [vmem:[%s2334_s0 + $0x50] sm:$0xff]  ;;  %v56_v17 = vld [vmem:[%s2334_s0 + $0x58] sm:$0xff]  ;;  %v57_v18 = vld [vmem:[%s2334_s0 + $0x60] sm:$0xff] }
   0x7   :  { %v58_v19 = vld [vmem:[%s2334_s0 + $0x68] sm:$0xff]  ;;  %v59_v20 = vld [vmem:[%s2334_s0 + $0x70] sm:$0xff]  ;;  %v60_v21 = vld [vmem:[%s2334_s0 + $0x78] sm:$0xff] }
   0x8   :  { %v1983_v22 = vld [vmem:[%s2335_s4 + $0x14] ss:$8 sps:$4 sm:$0xff]   ;;  %v1989_v23 = vld [vmem:[%s2335_s4 + $0x10] ss:$8 sps:$4 sm:$0xff]   ;;  %v1673_v24 = vld [vmem:[%s2336_s3 + $0x4] ss:$8 sps:$4 sm:$0xff]  }
   0x9   :  { %1602 = vmatpush3.msra.mxu0 %v63_v4  ;;  %v1675_v25 = vld [vmem:[%s2336_s3] ss:$8 sps:$4 sm:$0xff]   ;;  %369 = vmatprep.subr.bf16.mxu1 %v1673_v24  ;;  %v2001_v26 = vld [vmem:[%s2335_s4 + $0x24] ss:$8 sps:$4 sm:$0xff]   ;;  %v1679_v27 = vld [vmem:[%s2336_s3 + $0x14] ss:$8 sps:$4 sm:$0xff]  }
   0xa   :  { %1604 = vmatmul.mubr.msk.f32.vlgmr.msra.gmra.mrb[0].mxu0 %vm71_vm0, %v46_v5  ;;  %514 = vmatprep.subr.bf16.mxu0 %v1917_v7  ;;  %v1681_v28 = vld [vmem:[%s2336_s3 + $0x10] ss:$8 sps:$4 sm:$0xff]   ;;  %v2013_v29 = vld [vmem:[%s2335_s4 + $0x20] ss:$8 sps:$4 sm:$0xff]   ;;  %v1682_v30 = vld [vmem:[%s2336_s3 + $0x24] ss:$8 sps:$4 sm:$0xff]  }
   0xb   :  { %1606 = vmatprep.mubr.msk.f32.mxu0 %vm71_vm0, %v47_v6  ;;  %515 = vmatpush1.bf16.msra.mxu0 %v1922_v8  ;;  %v1684_v31 = vld [vmem:[%s2336_s3 + $0x20] ss:$8 sps:$4 sm:$0xff]   ;;  %v2025_v32 = vld [vmem:[%s2335_s4 + $0x34] ss:$8 sps:$4 sm:$0xff]   ;;  %v2030_v33 = vld [vmem:[%s2335_s4 + $0x30] ss:$8 sps:$4 sm:$0xff]  }
   0xc   :  { %516 = vmatprep.subr.bf16.mxu0 %v1983_v22  ;;  %370 = vmatpush1.bf16.msra.mxu1 %v1675_v25  ;;  %v1688_v34 = vld [vmem:[%s2336_s3 + $0x34] ss:$8 sps:$4 sm:$0xff]   ;;  %v1690_v35 = vld [vmem:[%s2336_s3 + $0x30] ss:$8 sps:$4 sm:$0xff]   ;;  %v1479_v43 = vld [vmem:[%s2337_s2] ss:$0 sm:$0xff] }
   0xd   :  { %371 = vmatprep.subr.bf16.mxu1 %v1679_v27 }
   0xe   :  { %1607 = vmatmul.mubr.msk.f32.gmra.mrb[2].mxu0 %vm71_vm0, %v48_v9 }
   0xf   :  { %1609 = vmatprep.mubr.msk.f32.mxu0 %vm71_vm0, %v49_v10  ;;  %517 = vmatpush1.bf16.msra.mxu0 %v1989_v23 }
  0x10   :  { %518 = vmatprep.subr.bf16.mxu0 %v2001_v26  ;;  %372 = vmatpush1.bf16.msra.mxu1 %v1681_v28 }
  0x11   :  { %373 = vmatprep.subr.bf16.mxu1 %v1682_v30 }
  0x12   :  { %1610 = vmatmul.mubr.msk.f32.gmra.mrb[4].mxu0 %vm71_vm0, %v50_v11 }
  0x13   :  { %1612 = vmatprep.mubr.msk.f32.mxu0 %vm71_vm0, %v51_v12  ;;  %519 = vmatpush1.bf16.msra.mxu0 %v2013_v29 }
  0x14   :  { %374 = vmatpush1.bf16.msra.mxu1 %v1684_v31  ;;  %520 = vmatprep.subr.bf16.mxu0 %v2025_v32 }
  0x15   :  { %375 = vmatprep.subr.bf16.mxu1 %v1688_v34 }
  0x16   :  { %1613 = vmatmul.mubr.msk.f32.gmra.mrb[6].mxu0 %vm71_vm0, %v52_v13 }
  0x17   :  { %1615 = vmatprep.mubr.msk.f32.mxu0 %vm71_vm0, %v53_v14  ;;  %521 = vmatpush1.bf16.msra.mxu0 %v2030_v33 }
  0x18   :  { %376 = vmatpush1.bf16.msra.mxu1 %v1690_v35  ;;  %666 = vmatprep.subr.bf16.mxu0 %v1917_v7 }
  0x19   :  { %590 = vmatprep.subr.bf16.mxu1 %v1917_v7 }
  0x1a   :  { %1616 = vmatmul.mubr.msk.f32.gmra.mrb[8].mxu0 %vm71_vm0, %v54_v15 }
  0x1b   :  { %1618 = vmatprep.mubr.msk.f32.mxu0 %vm71_vm0, %v55_v16 }
  0x1e   :  { %1619 = vmatmul.mubr.msk.f32.gmra.mrb[10].mxu0 %vm71_vm0, %v56_v17 }
  0x1f   :  { %1621 = vmatprep.mubr.msk.f32.mxu0 %vm71_vm0, %v57_v18 }
  0x22   :  { %1622 = vmatmul.mubr.msk.f32.gmra.mrb[12].mxu0 %vm71_vm0, %v58_v19 }
  0x23   :  { %1624 = vmatprep.mubr.msk.f32.mxu0 %vm71_vm0, %v59_v20 }
  0x26   :  { %1625 = vmatmul.mubr.msk.f32.gmra.mrb[14].mxu0 %vm71_vm0, %v60_v21 }
  0x27   :  { %546 = vmatprep.mubr.bf16.mxu0 %v1821_v36 }
  0x2a   :  { %547 = vmatmul.mubr.bf16.vlgmr.msra.gmra.mrb[16].mxu0 %v1821_v36 }
  0x2b   :  { %667 = vmatpush1.bf16.msra.mxu0 %v1922_v8  ;;  %698 = vmatprep.mubr.bf16.mxu0 %v1821_v36 }
  0x2c   :  { %668 = vmatprep.subr.bf16.mxu0 %v1983_v22 }
  0x2f   :  { %669 = vmatpush1.bf16.msra.mxu0 %v1989_v23 }
  0x30   :  { %670 = vmatprep.subr.bf16.mxu0 %v2001_v26 }
  0x33   :  { %671 = vmatpush1.bf16.msra.mxu0 %v2013_v29 }
  0x34   :  { %672 = vmatprep.subr.bf16.mxu0 %v2025_v32 }
  0x37   :  { %673 = vmatpush1.bf16.msra.mxu0 %v2030_v33 }
  0x38   :  { %818 = vmatprep.subr.bf16.mxu0 %v1917_v7 }
  0xdd   :  { %v1605_v37 = vpop.f32.mrb[0].mxu0 }
  0xde   :  { %v186_v38 = vpop.f32.mrb[1].mxu0  ;;  %v192_v46 = vadd.f32 %v1605_v37, %v1479_v43 }
  0xdf   :  { %v187_v47 = vadd.f32 %v1479_v43, %v186_v38 }
  0xe0   :  { %v266_v52 = vmax.f32 %v192_v46, 0.0 }
  0xe1   :  { %v1608_v39 = vpop.f32.mrb[2].mxu0  ;;  %v265_v55 = vmax.f32 %v187_v47, 0.0  ;;  %v289_v47 = vlaneseq }
  0xe2   :  { %v196_v40 = vpop.f32.mrb[3].mxu0  ;;  %v202_v53 = vadd.f32 %v1608_v39, %v1479_v43 }
  0xe3   :  { %v197_v56 = vadd.f32 %v1479_v43, %v196_v40 }
  0xe4   :  { %v268_v0 = vmax.f32 %v202_v53, 0.0 }
  0xe5   :  { %v1611_v41 = vpop.f32.mrb[4].mxu0  ;;  %v267_v3 = vmax.f32 %v197_v56, 0.0 }
  0xe6   :  { %v206_v42 = vpop.f32.mrb[5].mxu0  ;;  %v212_v1 = vadd.f32 %v1611_v41, %v1479_v43 }
  0xe7   :  { %v207_v4 = vadd.f32 %v1479_v43, %v206_v42 }
  0xe8   :  { %v270_v15 = vmax.f32 %v212_v1, 0.0 }
  0xe9   :  { %v1614_v44 = vpop.f32.mrb[6].mxu0  ;;  %v269_v18 = vmax.f32 %v207_v4, 0.0 }
  0xea   :  { %v216_v45 = vpop.f32.mrb[7].mxu0  ;;  %v222_v16 = vadd.f32 %v1614_v44, %v1479_v43 }
  0xeb   :  { %v217_v19 = vadd.f32 %v1479_v43, %v216_v45 }
  0xec   :  { %v272_v34 = vmax.f32 %v222_v16, 0.0 }
  0xed   :  { %v1617_v48 = vpop.f32.mrb[8].mxu0  ;;  %v271_v37 = vmax.f32 %v217_v19, 0.0 }
  0xee   :  { %v232_v49 = vadd.f32 %v1617_v48, %v1479_v43  ;;  %v226_v50 = vpop.f32.mrb[9].mxu0  ;;  %v2076_v48 = vshrl.u32 %v289_v47, 7 }
  0xef   :  { %v227_v51 = vadd.f32 %v1479_v43, %v226_v50  ;;  %v304_v50 = vld [vmem:[%s2338_s5] sm:$0x3]  ;;  %s1822_s5 = smov 64  }
  0xf0   :  { %v274_v54 = vmax.f32 %v232_v49, 0.0  ;;  %v308_v49 = vsub.s32 0, %v2076_v48 }
  0xf1   :  { %v273_v57 = vmax.f32 %v227_v51, 0.0  ;;  %v1620_v58 = vpop.f32.mrb[10].mxu0  ;;  %v312_v51 = vsub.s32 1, %v2076_v48 }
  0xf2   :  { %v282_v59 = vmax.f32 %v266_v52, %v274_v54  ;;  %v242_v60 = vadd.f32 %v1620_v58, %v1479_v43  ;;  %v236_v61 = vpop.f32.mrb[11].mxu0  ;;  %v309_v52 = vrot.slane %v304_v50, %v308_v49 }
  0xf3   :  { %v281_v62 = vmax.f32 %v265_v55, %v273_v57  ;;  %v237_v63 = vadd.f32 %v1479_v43, %v236_v61  ;;  %v313_v53 = vrot.slane %v304_v50, %v312_v51 }
  0xf4   :  { %v276_v2 = vmax.f32 %v242_v60, 0.0 }
  0xf5   :  { %v292_v5 = vpack.c.bf16 %v282_v59, %v281_v62  ;;  %v275_v6 = vmax.f32 %v237_v63, 0.0  ;;  %v1623_v9 = vpop.f32.mrb[12].mxu0 }
  0xf6   :  { %v284_v10 = vmax.f32 %v268_v0, %v276_v2  ;;  %v252_v11 = vadd.f32 %v1623_v9, %v1479_v43  ;;  %v246_v12 = vpop.f32.mrb[13].mxu0 }
  0xf7   :  { %v283_v13 = vmax.f32 %v267_v3, %v275_v6  ;;  %v247_v14 = vadd.f32 %v1479_v43, %v246_v12  ;;  %1504 = vmatmul.mubr.msk.bf16.vlgmr.msra.gmra.mrb[0].mxu1 %vm356_vm1, %v292_v5 }
  0xf8   :  { %v278_v17 = vmax.f32 %v252_v11, 0.0  ;;  %411 = vmatprep.mubr.bf16.mxu1 %v1821_v36  ;;  %591 = vmatpush1.bf16.msra.mxu1 %v1922_v8 }
  0xf9   :  { %v293_v20 = vpack.c.bf16 %v284_v10, %v283_v13  ;;  %v277_v21 = vmax.f32 %v247_v14, 0.0  ;;  %v1626_v24 = vpop.f32.mrb[14].mxu0  ;;  %592 = vmatprep.subr.bf16.mxu1 %v1983_v22 }
  0xfa   :  { %v286_v25 = vmax.f32 %v270_v15, %v278_v17  ;;  %v262_v27 = vadd.f32 %v1626_v24, %v1479_v43  ;;  %v256_v28 = vpop.f32.mrb[15].mxu0 }
  0xfb   :  { %v285_v30 = vmax.f32 %v269_v18, %v277_v21  ;;  %v257_v31 = vadd.f32 %v1479_v43, %v256_v28  ;;  %v2107_v28 = vand.u32 127, %v289_v47 }
  0xfc   :  { %v280_v35 = vmax.f32 %v262_v27, 0.0  ;;  %593 = vmatpush1.bf16.msra.mxu1 %v1989_v23 }
  0xfd   :  { %v294_v38 = vpack.c.bf16 %v286_v25, %v285_v30  ;;  %v279_v39 = vmax.f32 %v257_v31, 0.0  ;;  %594 = vmatprep.subr.bf16.mxu1 %v2001_v26  ;;  %v548_v43 = vpop.f32.mrb[16].mxu0  ;;  %vm291_vm2 = vcmp.lt.s32.totalorder %v2107_v28, 64  ;;  %v1712_v28 = vld [vmem:[%s2343_s11 + $0x8] sm:$0xff]  }
  0xfe   :  { %v2063_v40 = vmax.f32 %v272_v34, %v280_v35  ;;  %v550_v44 = vpop.f32.mrb[17].mxu0 }
  0xff   :  { %v287_v41 = vmax.f32 %v271_v37, %v279_v39  ;;  %1505 = vmatmul.mubr.msk.bf16.gmra.mrb[4].mxu1 %vm356_vm1, %v293_v20  ;;  %v552_v45 = vpop.f32.mrb[18].mxu0 }
 0x100   :  { %421 = vmatprep.mubr.bf16.mxu1 %v1821_v36  ;;  %595 = vmatpush1.bf16.msra.mxu1 %v2013_v29  ;;  %v553_v46 = vpop.f32.mrb[19].mxu0 }
 0x101   :  { %v295_v42 = vpack.c.bf16 %v2063_v40, %v287_v41  ;;  %596 = vmatprep.subr.bf16.mxu1 %v2025_v32 }
 0x104   :  { %597 = vmatpush1.bf16.msra.mxu1 %v2030_v33 }
 0x105   :  { %742 = vmatprep.subr.bf16.mxu1 %v1917_v7 }
 0x107   :  { %1506 = vmatmul.mubr.msk.bf16.gmra.mrb[8].mxu1 %vm356_vm1, %v294_v38 }
 0x108   :  { %431 = vmatprep.mubr.bf16.mxu1 %v1821_v36 }
 0x10f   :  { %1507 = vmatmul.mubr.msk.bf16.gmra.mrb[12].mxu1 %vm356_vm1, %v295_v42 }
 0x110   :  { %622 = vmatprep.mubr.bf16.mxu1 %v1821_v36 }
 0x1ca   :  { %v403_v54 = vpop.f32.mrb[0].mxu1 }
 0x1cb   :  { %v404_v55 = vadd.f32 %v403_v54, %v309_v52  ;;  %v405_v56 = vpop.f32.mrb[1].mxu1 }
 0x1cc   :  { %v406_v57 = vadd.f32 %v405_v56, %v313_v53  ;;  %v407_v58 = vpop.f32.mrb[2].mxu1 }
 0x1cd   :  { %v555_v59 = vadd.f32 %v548_v43, %v404_v55  ;;  %v2087_v60 = vadd.f32 %v407_v58, %v309_v52  ;;  %v409_v61 = vpop.f32.mrb[3].mxu1 }
 0x1ce   :  { %v556_v62 = vadd.f32 %v550_v44, %v406_v57  ;;  %v2089_v63 = vadd.f32 %v409_v61, %v313_v53 }
 0x1cf   :  { %v1516_v0 = vmul.f32 -1.442695, %v555_v59 }
 0x1d0   :  { %v1517_v1 = vmul.f32 -1.442695, %v556_v62 }
 0x1d1   :  { %1713 = vpow2.f32 %v1516_v0 }
 0x1d2   :  { %1715 = vpow2.f32 %v1517_v1  ;;  %v413_v2 = vpop.f32.mrb[4].mxu1 }
 0x1d3   :  { %v2091_v3 = vadd.f32 %v413_v2, %v309_v52  ;;  %v415_v4 = vpop.f32.mrb[5].mxu1  ;;  %1717 = vtanh.f32 %v556_v62 }
 0x1d4   :  { %v2093_v5 = vadd.f32 %v415_v4, %v313_v53  ;;  %v417_v6 = vpop.f32.mrb[6].mxu1 }
 0x1d5   :  { %v2095_v9 = vadd.f32 %v417_v6, %v309_v52  ;;  %v419_v10 = vpop.f32.mrb[7].mxu1 }
 0x1d6   :  { %v2097_v11 = vadd.f32 %v419_v10, %v313_v53 }
 0x1da   :  { %v423_v12 = vpop.f32.mrb[8].mxu1 }
 0x1db   :  { %v1714_v13 = vpop.eup %1713  ;;  %v2099_v14 = vadd.f32 %v423_v12, %v309_v52  ;;  %v425_v15 = vpop.f32.mrb[9].mxu1 }
 0x1dc   :  { %v1716_v16 = vpop.eup %1715  ;;  %v560_v17 = vadd.f32 1.0, %v1714_v13  ;;  %v2101_v18 = vadd.f32 %v425_v15, %v313_v53  ;;  %v427_v19 = vpop.f32.mrb[10].mxu1 }
 0x1dd   :  { %v567_v20 = vadd.f32 1.0, %v1716_v16  ;;  %v2103_v21 = vadd.f32 %v427_v19, %v309_v52  ;;  %v429_v24 = vpop.f32.mrb[11].mxu1  ;;  %v1718_v41 = vpop.eup %1717 }
 0x1de   :  { %1719 = vrcp.f32 %v560_v17  ;;  %v2105_v25 = vadd.f32 %v429_v24, %v313_v53 }
 0x1df   :  { %1721 = vrcp.f32 %v567_v20 }
 0x1e2   :  { %v433_v27 = vpop.f32.mrb[12].mxu1 }
 0x1e3   :  { %v2109_v30 = vadd.f32 %v433_v27, %v309_v52  ;;  %v435_v31 = vpop.f32.mrb[13].mxu1 }
 0x1e4   :  { %v2111_v34 = vadd.f32 %v435_v31, %v313_v53  ;;  %v437_v35 = vpop.f32.mrb[14].mxu1 }
 0x1e5   :  { %v2113_v37 = vadd.f32 %v437_v35, %v309_v52  ;;  %v439_v38 = vpop.f32.mrb[15].mxu1 }
 0x1e6   :  { %v2115_v39 = vadd.f32 %v439_v38, %v313_v53 }
 0x1e8   :  { %v1720_v42 = vpop.eup %1719 }
 0x1e9   :  { %v1722_v43 = vpop.eup %1721  ;;  %573 = vrot.lane.b32.xlu0 %v1720_v42, %s1822_s5 }
 0x1ea   :  { %v570_v44 = vsel %vm291_vm2, %v1718_v41, %v1722_v43 }
 0x1eb   :  { %v571_v45 = vmul.f32 %v1720_v42, %v570_v44 }
 0x1ed   :  { %577 = vrot.lane.b32.xlu0 %v570_v44, %s1822_s5  ;;  %v572_v50 = vsel %vm291_vm2, %v571_v45, 0.0 }
 0x25b   :  { %v574_v46 = vpop.permute.xlu0 %573 }
 0x25c   :  { %v575_v47 = vmul.f32 0.0, %v574_v46 }
 0x25e   :  { %v576_v52 = vadd.f32 %v575_v47, %v572_v50 }
 0x25f   :  { %v578_v54 = vpop.permute.xlu0 %577 }
 0x260   :  { %1723 = vtanh.f32 %v576_v52 }
 0x26a   :  { %v1724_v53 = vpop.eup %1723 }
 0x26b   :  { %v580_v55 = vmul.f32 %v1724_v53, %v578_v54 }
 0x26d   :  { %v586_v56 = vpack.c.bf16 %v580_v55, %v580_v55 }
 0x26f   :  { %1518 = vmatmul.mubr.msk.bf16.vlgmr.msra.gmra.mrb[16].mxu1 %vm356_vm1, %v586_v56 }
 0x270   :  { %743 = vmatpush1.bf16.msra.mxu1 %v1922_v8  ;;  %774 = vmatprep.mubr.bf16.mxu1 %v1821_v36 }
 0x271   :  { %744 = vmatprep.subr.bf16.mxu1 %v1983_v22 }
 0x274   :  { %745 = vmatpush1.bf16.msra.mxu1 %v1989_v23 }
 0x275   :  { %746 = vmatprep.subr.bf16.mxu1 %v2001_v26 }
 0x278   :  { %747 = vmatpush1.bf16.msra.mxu1 %v2013_v29 }
 0x279   :  { %748 = vmatprep.subr.bf16.mxu1 %v2025_v32 }
 0x27c   :  { %749 = vmatpush1.bf16.msra.mxu1 %v2030_v33 }
 0x27d   :  { %894 = vmatprep.subr.bf16.mxu1 %v1917_v7 }
 0x342   :  { %v624_v57 = vpop.f32.mrb[16].mxu1 }
 0x343   :  { %v631_v58 = vadd.f32 %v624_v57, %v2087_v60  ;;  %v626_v59 = vpop.f32.mrb[17].mxu1 }
 0x344   :  { %v632_v61 = vadd.f32 %v626_v59, %v2089_v63  ;;  %v628_v62 = vpop.f32.mrb[18].mxu1 }
 0x345   :  { %v1519_v0 = vmul.f32 -1.442695, %v631_v58  ;;  %v629_v1 = vpop.f32.mrb[19].mxu1 }
 0x346   :  { %v1520_v2 = vmul.f32 -1.442695, %v632_v61 }
 0x347   :  { %1725 = vpow2.f32 %v1519_v0 }
 0x348   :  { %1727 = vpow2.f32 %v1520_v2 }
 0x349   :  { %1729 = vtanh.f32 %v632_v61 }
 0x351   :  { %v1726_v4 = vpop.eup %1725 }
 0x352   :  { %v1728_v6 = vpop.eup %1727  ;;  %v636_v10 = vadd.f32 1.0, %v1726_v4 }
 0x353   :  { %v643_v12 = vadd.f32 1.0, %v1728_v6  ;;  %v1730_v13 = vpop.eup %1729 }
 0x354   :  { %1731 = vrcp.f32 %v636_v10 }
 0x355   :  { %1733 = vrcp.f32 %v643_v12 }
 0x35e   :  { %v1732_v15 = vpop.eup %1731 }
 0x35f   :  { %v1734_v16 = vpop.eup %1733  ;;  %649 = vrot.lane.b32.xlu1 %v1732_v15, %s1822_s5 }
 0x360   :  { %v646_v60 = vsel %vm291_vm2, %v1730_v13, %v1734_v16 }
 0x361   :  { %v647_v63 = vmul.f32 %v1732_v15, %v646_v60 }
 0x363   :  { %653 = vrot.lane.b32.xlu1 %v646_v60, %s1822_s5  ;;  %v648_v20 = vsel %vm291_vm2, %v647_v63, 0.0 }
 0x3d1   :  { %v650_v17 = vpop.permute.xlu1 %649 }
 0x3d2   :  { %v651_v19 = vmul.f32 %v650_v17, %v576_v52 }
 0x3d4   :  { %v652_v24 = vadd.f32 %v651_v19, %v648_v20 }
 0x3d5   :  { %v654_v31 = vpop.permute.xlu1 %653 }
 0x3d6   :  { %1735 = vtanh.f32 %v652_v24 }
 0x3e0   :  { %v1736_v27 = vpop.eup %1735 }
 0x3e1   :  { %v656_v35 = vmul.f32 %v1736_v27, %v654_v31 }
 0x3e3   :  { %v662_v38 = vpack.c.bf16 %v656_v35, %v656_v35 }
 0x3e5   :  { %1521 = vmatmul.mubr.msk.bf16.vlgmr.msra.gmra.mrb[20].mxu0 %vm356_vm1, %v662_v38 }
 0x3e6   :  { %819 = vmatpush1.bf16.msra.mxu0 %v1922_v8  ;;  %850 = vmatprep.mubr.bf16.mxu0 %v1821_v36 }
 0x3e7   :  { %820 = vmatprep.subr.bf16.mxu0 %v1983_v22 }
 0x3ea   :  { %821 = vmatpush1.bf16.msra.mxu0 %v1989_v23 }
 0x3eb   :  { %822 = vmatprep.subr.bf16.mxu0 %v2001_v26 }
 0x3ee   :  { %823 = vmatpush1.bf16.msra.mxu0 %v2013_v29 }
 0x3ef   :  { %824 = vmatprep.subr.bf16.mxu0 %v2025_v32 }
 0x3f2   :  { %825 = vmatpush1.bf16.msra.mxu0 %v2030_v33 }
 0x3f3   :  { %970 = vmatprep.subr.bf16.mxu0 %v1917_v7 }
 0x4b8   :  { %v700_v41 = vpop.f32.mrb[20].mxu0 }
 0x4b9   :  { %v707_v42 = vadd.f32 %v700_v41, %v2091_v3  ;;  %v702_v43 = vpop.f32.mrb[21].mxu0 }
 0x4ba   :  { %v708_v44 = vadd.f32 %v702_v43, %v2093_v5  ;;  %v704_v45 = vpop.f32.mrb[22].mxu0 }
 0x4bb   :  { %v1522_v46 = vmul.f32 -1.442695, %v707_v42  ;;  %v705_v47 = vpop.f32.mrb[23].mxu0 }
 0x4bc   :  { %v1523_v50 = vmul.f32 -1.442695, %v708_v44 }
 0x4bd   :  { %1737 = vpow2.f32 %v1522_v46 }
 0x4be   :  { %1739 = vpow2.f32 %v1523_v50 }
 0x4bf   :  { %1741 = vtanh.f32 %v708_v44 }
 0x4c7   :  { %v1738_v52 = vpop.eup %1737 }
 0x4c8   :  { %v1740_v53 = vpop.eup %1739  ;;  %v712_v54 = vadd.f32 1.0, %v1738_v52 }
 0x4c9   :  { %v719_v55 = vadd.f32 1.0, %v1740_v53  ;;  %v1742_v56 = vpop.eup %1741 }
 0x4ca   :  { %1743 = vrcp.f32 %v712_v54 }
 0x4cb   :  { %1745 = vrcp.f32 %v719_v55 }
 0x4d4   :  { %v1744_v57 = vpop.eup %1743 }
 0x4d5   :  { %v1746_v58 = vpop.eup %1745  ;;  %725 = vrot.lane.b32.xlu0 %v1744_v57, %s1822_s5 }
 0x4d6   :  { %v722_v3 = vsel %vm291_vm2, %v1742_v56, %v1746_v58 }
 0x4d7   :  { %729 = vrot.lane.b32.xlu1 %v722_v3, %s1822_s5  ;;  %v723_v5 = vmul.f32 %v1744_v57, %v722_v3 }
 0x4d9   :  { %v724_v62 = vsel %vm291_vm2, %v723_v5, 0.0 }
 0x547   :  { %v726_v59 = vpop.permute.xlu0 %725 }
 0x548   :  { %v727_v61 = vmul.f32 %v726_v59, %v652_v24 }
 0x549   :  { %v730_v2 = vpop.permute.xlu1 %729 }
 0x54a   :  { %v728_v0 = vadd.f32 %v727_v61, %v724_v62 }
 0x54c   :  { %1747 = vtanh.f32 %v728_v0 }
 0x556   :  { %v1748_v1 = vpop.eup %1747 }
 0x557   :  { %v732_v4 = vmul.f32 %v1748_v1, %v730_v2 }
 0x559   :  { %v738_v6 = vpack.c.bf16 %v732_v4, %v732_v4 }
 0x55b   :  { %1524 = vmatmul.mubr.msk.bf16.vlgmr.msra.gmra.mrb[20].mxu1 %vm356_vm1, %v738_v6 }
 0x55c   :  { %895 = vmatpush1.bf16.msra.mxu1 %v1922_v8  ;;  %926 = vmatprep.mubr.bf16.mxu1 %v1821_v36 }
 0x55d   :  { %896 = vmatprep.subr.bf16.mxu1 %v1983_v22 }
 0x560   :  { %897 = vmatpush1.bf16.msra.mxu1 %v1989_v23 }
 0x561   :  { %898 = vmatprep.subr.bf16.mxu1 %v2001_v26 }
 0x564   :  { %899 = vmatpush1.bf16.msra.mxu1 %v2013_v29 }
 0x565   :  { %900 = vmatprep.subr.bf16.mxu1 %v2025_v32 }
 0x568   :  { %901 = vmatpush1.bf16.msra.mxu1 %v2030_v33 }
 0x569   :  { %1046 = vmatprep.subr.bf16.mxu1 %v1917_v7 }
 0x62e   :  { %v776_v10 = vpop.f32.mrb[20].mxu1 }
 0x62f   :  { %v783_v12 = vadd.f32 %v776_v10, %v2095_v9  ;;  %v778_v13 = vpop.f32.mrb[21].mxu1 }
 0x630   :  { %v784_v15 = vadd.f32 %v778_v13, %v2097_v11  ;;  %v780_v16 = vpop.f32.mrb[22].mxu1 }
 0x631   :  { %v1525_v60 = vmul.f32 -1.442695, %v783_v12  ;;  %v781_v63 = vpop.f32.mrb[23].mxu1 }
 0x632   :  { %v1526_v17 = vmul.f32 -1.442695, %v784_v15 }
 0x633   :  { %1749 = vpow2.f32 %v1525_v60 }
 0x634   :  { %1751 = vpow2.f32 %v1526_v17 }
 0x635   :  { %1753 = vtanh.f32 %v784_v15 }
 0x63d   :  { %v1750_v19 = vpop.eup %1749 }
 0x63e   :  { %v1752_v20 = vpop.eup %1751  ;;  %v788_v24 = vadd.f32 1.0, %v1750_v19 }
 0x63f   :  { %v795_v27 = vadd.f32 1.0, %v1752_v20  ;;  %v1754_v7 = vpop.eup %1753 }
 0x640   :  { %1755 = vrcp.f32 %v788_v24 }
 0x641   :  { %1757 = vrcp.f32 %v795_v27 }
 0x64a   :  { %v1756_v31 = vpop.eup %1755 }
 0x64b   :  { %v1758_v35 = vpop.eup %1757  ;;  %801 = vrot.lane.b32.xlu0 %v1756_v31, %s1822_s5 }
 0x64c   :  { %v798_v9 = vsel %vm291_vm2, %v1754_v7, %v1758_v35 }
 0x64d   :  { %805 = vrot.lane.b32.xlu1 %v798_v9, %s1822_s5  ;;  %v799_v11 = vmul.f32 %v1756_v31, %v798_v9  ;;  %v1693_v31 = vld [vmem:[%s2339_s6 + $0x4] ss:$8 sps:$4 sm:$0xff]  }
 0x64f   :  { %v800_v42 = vsel %vm291_vm2, %v799_v11, 0.0 }
 0x6bd   :  { %v802_v38 = vpop.permute.xlu0 %801 }
 0x6be   :  { %v803_v41 = vmul.f32 %v802_v38, %v728_v0 }
 0x6bf   :  { %v806_v45 = vpop.permute.xlu1 %805 }
 0x6c0   :  { %v804_v43 = vadd.f32 %v803_v41, %v800_v42 }
 0x6c2   :  { %1759 = vtanh.f32 %v804_v43 }
 0x6cc   :  { %v1760_v44 = vpop.eup %1759 }
 0x6cd   :  { %v808_v46 = vmul.f32 %v1760_v44, %v806_v45  ;;  %v1691_v44 = vld [vmem:[%s2339_s6] ss:$8 sps:$4 sm:$0xff]  }
 0x6cf   :  { %v814_v47 = vpack.c.bf16 %v808_v46, %v808_v46  ;;  %v1696_v46 = vld [vmem:[%s2339_s6 + $0x14] ss:$8 sps:$4 sm:$0xff]  }
 0x6d1   :  { %1527 = vmatmul.mubr.msk.bf16.vlgmr.msra.gmra.mrb[24].mxu0 %vm356_vm1, %v814_v47  ;;  %v1694_v47 = vld [vmem:[%s2339_s6 + $0x10] ss:$8 sps:$4 sm:$0xff]  }
 0x6d2   :  { %971 = vmatpush1.bf16.msra.mxu0 %v1922_v8  ;;  %1002 = vmatprep.mubr.bf16.mxu0 %v1821_v36 }
 0x6d3   :  { %972 = vmatprep.subr.bf16.mxu0 %v1983_v22 }
 0x6d6   :  { %973 = vmatpush1.bf16.msra.mxu0 %v1989_v23 }
 0x6d7   :  { %974 = vmatprep.subr.bf16.mxu0 %v2001_v26 }
 0x6da   :  { %975 = vmatpush1.bf16.msra.mxu0 %v2013_v29 }
 0x6db   :  { %976 = vmatprep.subr.bf16.mxu0 %v2025_v32 }
 0x6de   :  { %977 = vmatpush1.bf16.msra.mxu0 %v2030_v33 }
 0x6df   :  { %1177 = vmatprep.subr.bf16.mxu0 %v1693_v31  ;;  %v1703_v31 = vld [vmem:[%s2341_s9] sm:$0xff]  }
 0x7a4   :  { %v852_v50 = vpop.f32.mrb[24].mxu0 }
 0x7a5   :  { %v859_v52 = vadd.f32 %v852_v50, %v2099_v14  ;;  %v854_v53 = vpop.f32.mrb[25].mxu0  ;;  %v1699_v50 = vld [vmem:[%s2339_s6 + $0x24] ss:$8 sps:$4 sm:$0xff]  }
 0x7a6   :  { %v860_v54 = vadd.f32 %v854_v53, %v2101_v18  ;;  %v856_v55 = vpop.f32.mrb[26].mxu0  ;;  %v1702_v53 = vld [vmem:[%s2339_s6 + $0x34] ss:$8 sps:$4 sm:$0xff]  }
 0x7a7   :  { %v1528_v56 = vmul.f32 -1.442695, %v859_v52  ;;  %v857_v57 = vpop.f32.mrb[27].mxu0  ;;  %v1697_v52 = vld [vmem:[%s2339_s6 + $0x20] ss:$8 sps:$4 sm:$0xff]  }
 0x7a8   :  { %v1529_v58 = vmul.f32 -1.442695, %v860_v54 }
 0x7a9   :  { %1761 = vpow2.f32 %v1528_v56 }
 0x7aa   :  { %1763 = vpow2.f32 %v1529_v58 }
 0x7ab   :  { %1765 = vtanh.f32 %v860_v54  ;;  %v1113_v54 = vpack.c.bf16 %v2063_v40, %v2063_v40 }
 0x7b3   :  { %v1762_v3 = vpop.eup %1761 }
 0x7b4   :  { %v1764_v5 = vpop.eup %1763  ;;  %v864_v59 = vadd.f32 1.0, %v1762_v3 }
 0x7b5   :  { %v871_v61 = vadd.f32 1.0, %v1764_v5  ;;  %v1766_v62 = vpop.eup %1765 }
 0x7b6   :  { %1767 = vrcp.f32 %v864_v59 }
 0x7b7   :  { %1769 = vrcp.f32 %v871_v61 }
 0x7c0   :  { %v1768_v0 = vpop.eup %1767 }
 0x7c1   :  { %v1770_v1 = vpop.eup %1769  ;;  %877 = vrot.lane.b32.xlu0 %v1768_v0, %s1822_s5 }
 0x7c2   :  { %v874_v14 = vsel %vm291_vm2, %v1766_v62, %v1770_v1  ;;  %v1122_v62 = vld [vmem:[%s2340_s7] sm:$0x3] }
 0x7c3   :  { %881 = vrot.lane.b32.xlu1 %v874_v14, %s1822_s5  ;;  %v875_v18 = vmul.f32 %v1768_v0, %v874_v14  ;;  %v1127_v40 = vrot.slane %v1122_v62, %v308_v49  ;;  %v1131_v0 = vrot.slane %v1122_v62, %v312_v51  ;;  %v1708_v62 = vld [vmem:[%s2342_s8 + $0x8] sm:$0xff]  }
 0x7c5   :  { %v876_v6 = vsel %vm291_vm2, %v875_v18, 0.0 }
 0x833   :  { %v878_v2 = vpop.permute.xlu0 %877 }
 0x834   :  { %v879_v4 = vmul.f32 %v878_v2, %v804_v43 }
 0x835   :  { %v882_v13 = vpop.permute.xlu1 %881 }
 0x836   :  { %v880_v10 = vadd.f32 %v879_v4, %v876_v6 }
 0x838   :  { %1771 = vtanh.f32 %v880_v10 }
 0x842   :  { %v1772_v12 = vpop.eup %1771 }
 0x843   :  { %v884_v15 = vmul.f32 %v1772_v12, %v882_v13 }
 0x845   :  { %v890_v16 = vpack.c.bf16 %v884_v15, %v884_v15 }
 0x847   :  { %1530 = vmatmul.mubr.msk.bf16.vlgmr.msra.gmra.mrb[24].mxu1 %vm356_vm1, %v890_v16 }
 0x848   :  { %1047 = vmatpush1.bf16.msra.mxu1 %v1922_v8  ;;  %1078 = vmatprep.mubr.bf16.mxu1 %v1821_v36 }
 0x849   :  { %1048 = vmatprep.subr.bf16.mxu1 %v1983_v22 }
 0x84c   :  { %1049 = vmatpush1.bf16.msra.mxu1 %v1989_v23 }
 0x84d   :  { %1050 = vmatprep.subr.bf16.mxu1 %v2001_v26 }
 0x850   :  { %1051 = vmatpush1.bf16.msra.mxu1 %v2013_v29 }
 0x851   :  { %1052 = vmatprep.subr.bf16.mxu1 %v2025_v32 }
 0x854   :  { %1053 = vmatpush1.bf16.msra.mxu1 %v2030_v33 }
 0x91a   :  { %v928_v60 = vpop.f32.mrb[24].mxu1 }
 0x91b   :  { %v935_v63 = vadd.f32 %v928_v60, %v2103_v21  ;;  %v930_v17 = vpop.f32.mrb[25].mxu1 }
 0x91c   :  { %v936_v8 = vadd.f32 %v930_v17, %v2105_v25  ;;  %v932_v19 = vpop.f32.mrb[26].mxu1  ;;  %v1823_v17 = vmov 0.0  }
 0x91d   :  { %v1531_v20 = vmul.f32 -1.442695, %v935_v63  ;;  %v933_v24 = vpop.f32.mrb[27].mxu1  ;;  %1627 = vmatprep.subr.bf16.mxu1 %v1823_v17 }
 0x91e   :  { %v1532_v22 = vmul.f32 -1.442695, %v936_v8 }
 0x91f   :  { %1773 = vpow2.f32 %v1531_v20 }
 0x920   :  { %1775 = vpow2.f32 %v1532_v22 }
 0x921   :  { %1777 = vtanh.f32 %v936_v8 }
 0x929   :  { %v1774_v23 = vpop.eup %1773 }
 0x92a   :  { %v1776_v26 = vpop.eup %1775  ;;  %v940_v27 = vadd.f32 1.0, %v1774_v23 }
 0x92b   :  { %v947_v29 = vadd.f32 1.0, %v1776_v26  ;;  %v1778_v32 = vpop.eup %1777 }
 0x92c   :  { %1779 = vrcp.f32 %v940_v27 }
 0x92d   :  { %1781 = vrcp.f32 %v947_v29 }
 0x936   :  { %v1780_v33 = vpop.eup %1779 }
 0x937   :  { %v1782_v7 = vpop.eup %1781  ;;  %953 = vrot.lane.b32.xlu0 %v1780_v33, %s1822_s5 }
 0x938   :  { %v950_v21 = vsel %vm291_vm2, %v1778_v32, %v1782_v7 }
 0x939   :  { %957 = vrot.lane.b32.xlu1 %v950_v21, %s1822_s5  ;;  %v951_v25 = vmul.f32 %v1780_v33, %v950_v21 }
 0x93b   :  { %v952_v11 = vsel %vm291_vm2, %v951_v25, 0.0 }
 0x9a9   :  { %v954_v35 = vpop.permute.xlu0 %953 }
 0x9aa   :  { %v955_v9 = vmul.f32 %v954_v35, %v880_v10 }
 0x9ab   :  { %v958_v42 = vpop.permute.xlu1 %957 }
 0x9ac   :  { %v2215_v38 = vadd.f32 %v955_v9, %v952_v11  ;;  %v1704_v11 = vld [vmem:[%s2341_s9 + $0x8] sm:$0xff]  }
 0x9ae   :  { %1783 = vtanh.f32 %v2215_v38 }
 0x9b8   :  { %v1784_v41 = vpop.eup %1783 }
 0x9b9   :  { %v960_v43 = vmul.f32 %v1784_v41, %v958_v42  ;;  %v1706_v42 = vld [vmem:[%s2341_s9 + $0x18] sm:$0xff]  }
 0x9bb   :  { %v966_v45 = vpack.c.bf16 %v960_v43, %v960_v43 }
 0x9bd   :  { %1533 = vmatmul.mubr.msk.bf16.vlgmr.msra.gmra.mrb[28].mxu0 %vm356_vm1, %v966_v45 }
 0x9be   :  { %1178 = vmatpush1.bf16.msra.mxu0 %v1691_v44  ;;  %1209 = vmatprep.mubr.bf16.mxu0 %v1821_v36  ;;  %v1700_v36 = vld [vmem:[%s2339_s6 + $0x30] ss:$8 sps:$4 sm:$0xff]  }
 0x9bf   :  { %1179 = vmatprep.subr.bf16.mxu0 %v1696_v46 }
 0x9c2   :  { %1180 = vmatpush1.bf16.msra.mxu0 %v1694_v47 }
 0x9c3   :  { %1181 = vmatprep.subr.bf16.mxu0 %v1699_v50 }
 0x9c6   :  { %1182 = vmatpush1.bf16.msra.mxu0 %v1697_v52 }
 0x9c7   :  { %1183 = vmatprep.subr.bf16.mxu0 %v1702_v53 }
 0x9ca   :  { %1184 = vmatpush1.bf16.msra.mxu0 %v1700_v36 }
 0x9cb   :  { %1639 = vmatprep.subr.bf16.mxu0 %v1823_v17 }
 0x9cd   :  { %1547 = vmatmul.mubr.msk.bf16.vlgmr.msra.gmra.mrb[32].mxu0 %vm356_vm1, %v1113_v54 }
 0x9ce   :  { %1647 = vmatprep.mubr.msk.bf16.mxu0 %vm1824_vm3, %v1823_v17 }
 0xa90   :  { %v1004_v55 = vpop.f32.mrb[28].mxu0 }
 0xa91   :  { %v1011_v56 = vadd.f32 %v1004_v55, %v2109_v30  ;;  %v1006_v57 = vpop.f32.mrb[29].mxu0 }
 0xa92   :  { %v1012_v58 = vadd.f32 %v1006_v57, %v2111_v34  ;;  %v1008_v3 = vpop.f32.mrb[30].mxu0 }
 0xa93   :  { %v1534_v5 = vmul.f32 -1.442695, %v1011_v56  ;;  %v1009_v59 = vpop.f32.mrb[31].mxu0 }
 0xa94   :  { %v1535_v61 = vmul.f32 -1.442695, %v1012_v58 }
 0xa95   :  { %1785 = vpow2.f32 %v1534_v5 }
 0xa96   :  { %1787 = vpow2.f32 %v1535_v61 }
 0xa97   :  { %1789 = vtanh.f32 %v1012_v58 }
 0xa9f   :  { %v1786_v30 = vpop.eup %1785 }
 0xaa0   :  { %v1788_v1 = vpop.eup %1787  ;;  %v1016_v14 = vadd.f32 1.0, %v1786_v30  ;;  %v1211_v34 = vpop.f32.mrb[32].mxu0  ;;  %v1709_v30 = vld [vmem:[%s2342_s8 + $0x10] sm:$0xff]  }
 0xaa1   :  { %v1023_v18 = vadd.f32 1.0, %v1788_v1  ;;  %v1212_v2 = vadd.f32 %v1211_v34, %v1127_v40  ;;  %v1213_v4 = vpop.f32.mrb[33].mxu0  ;;  %v1790_v15 = vpop.eup %1789 }
 0xaa2   :  { %1791 = vrcp.f32 %v1016_v14  ;;  %v1214_v6 = vadd.f32 %v1213_v4, %v1131_v0  ;;  %v1215_v10 = vpop.f32.mrb[34].mxu0 }
 0xaa3   :  { %1793 = vrcp.f32 %v1023_v18  ;;  %v1549_v12 = vmul.f32 -1.442695, %v1212_v2  ;;  %v1216_v13 = vpop.f32.mrb[35].mxu0  ;;  %v1710_v18 = vld [vmem:[%s2342_s8 + $0x18] sm:$0xff]  }
 0xaa4   :  { %v1548_v24 = vmul.f32 -1.442695, %v1214_v6 }
 0xaa5   :  { %1795 = vpow2.f32 %v1549_v12 }
 0xaa6   :  { %1797 = vtanh.f32 %v1212_v2 }
 0xaac   :  { %v1792_v49 = vpop.eup %1791 }
 0xaad   :  { %v1794_v16 = vpop.eup %1793  ;;  %1029 = vrot.lane.b32.xlu0 %v1792_v49, %s1822_s5 }
 0xaae   :  { %v1026_v48 = vsel %vm291_vm2, %v1790_v15, %v1794_v16  ;;  %v1711_v16 = vld [vmem:[%s2343_s11] sm:$0xff]  }
 0xaaf   :  { %v1796_v51 = vpop.eup %1795  ;;  %1033 = vrot.lane.b32.xlu1 %v1026_v48, %s1822_s5  ;;  %v1027_v60 = vmul.f32 %v1792_v49, %v1026_v48 }
 0xab0   :  { %v1227_v63 = vadd.f32 1.0, %v1796_v51  ;;  %v1798_v8 = vpop.eup %1797  ;;  %v1560_v51 = vld [vmem:[%s2344_s10] ss:$0 sm:$0xff] }
 0xab1   :  { %v1028_v26 = vsel %vm291_vm2, %v1027_v60, 0.0 }
 0xab2   :  { %1799 = vrcp.f32 %v1227_v63 }
 0xab3   :  { %1801 = vpow2.f32 %v1548_v24 }
 0xabc   :  { %v1800_v19 = vpop.eup %1799 }
 0xabd   :  { %v1231_v20 = vsel %vm291_vm2, %v1800_v19, %v1798_v8  ;;  %v1802_v29 = vpop.eup %1801 }
 0xabe   :  { %1232 = vrot.lane.b32.xlu1 %v1231_v20, %s1822_s5  ;;  %v1221_v7 = vadd.f32 1.0, %v1802_v29 }
 0xb1f   :  { %v1030_v22 = vpop.permute.xlu0 %1029 }
 0xb20   :  { %v1031_v23 = vmul.f32 %v1030_v22, %v2215_v38  ;;  %v1705_v38 = vld [vmem:[%s2341_s9 + $0x10] sm:$0xff]  }
 0xb21   :  { %v1034_v32 = vpop.permute.xlu1 %1033 }
 0xb22   :  { %v2267_v27 = vadd.f32 %v1031_v23, %v1028_v26 }
 0xb24   :  { %1803 = vtanh.f32 %v2267_v27 }
 0xb25   :  { %1805 = vrcp.f32 %v1221_v7 }
 0xb2e   :  { %v1804_v33 = vpop.eup %1803 }
 0xb2f   :  { %v1036_v21 = vmul.f32 %v1804_v33, %v1034_v32  ;;  %v1806_v41 = vpop.eup %1805 }
 0xb30   :  { %v1233_v25 = vpop.permute.xlu1 %1232 }
 0xb31   :  { %v1042_v35 = vpack.c.bf16 %v1036_v21, %v1036_v21  ;;  %v1234_v9 = vmul.f32 %v1233_v25, %v1231_v20 }
 0xb33   :  { %1807 = vtanh.f32 %v1234_v9  ;;  %1536 = vmatmul.mubr.msk.bf16.vlgmr.msra.gmra.mrb[28].mxu1 %vm356_vm1, %v1042_v35 }
 0xb34   :  { %1628 = vmatpush3.bf16.msra.mxu1 %v1703_v31  ;;  %1635 = vmatprep.mubr.msk.bf16.mxu1 %vm1824_vm3, %v1823_v17 }
 0xb35   :  { %1629 = vmatprep.subr.bf16.mxu1 %v1823_v17 }
 0xb38   :  { %1630 = vmatpush3.bf16.msra.mxu1 %v1704_v11 }
 0xb39   :  { %1631 = vmatprep.subr.bf16.mxu1 %v1823_v17 }
 0xb3c   :  { %1632 = vmatpush3.bf16.msra.mxu1 %v1705_v38 }
 0xb3d   :  { %v1808_v43 = vpop.eup %1807  ;;  %1633 = vmatprep.subr.bf16.mxu1 %v1823_v17 }
 0xb3e   :  { %v1236_v44 = vmul.f32 %v1808_v43, %v1806_v41 }
 0xb40   :  { %1634 = vmatpush3.bf16.msra.mxu1 %v1706_v42  ;;  %v1246_v45 = vpack.c.bf16 %v1236_v44, %v1236_v44 }
 0xb41   :  { %1651 = vmatprep.subr.bf16.mxu1 %v1823_v17 }
 0xb43   :  { %1636 = vmatmul.mubr.msk.bf16.vlgmr.msra.gmra.mrb[32].mxu1 %vm356_vm1, %v1246_v45 }
 0xb44   :  { %1655 = vmatprep.mubr.msk.bf16.mxu1 %vm1824_vm3, %v1823_v17  ;;  %1652 = vmatpush3.bf16.msra.mxu1 %v1711_v16 }
 0xb45   :  { %1653 = vmatprep.subr.bf16.mxu1 %v1823_v17 }
 0xb48   :  { %1654 = vmatpush3.bf16.msra.mxu1 %v1712_v28 }
 0xc06   :  { %v1080_v46 = vpop.f32.mrb[28].mxu1 }
 0xc07   :  { %v1087_v47 = vadd.f32 %v1080_v46, %v2113_v37  ;;  %v1082_v50 = vpop.f32.mrb[29].mxu1 }
 0xc08   :  { %v1088_v52 = vadd.f32 %v1082_v50, %v2115_v39  ;;  %v1084_v53 = vpop.f32.mrb[30].mxu1  ;;  %v1707_v39 = vld [vmem:[%s2342_s8] sm:$0xff]  }
 0xc09   :  { %v1537_v36 = vmul.f32 -1.442695, %v1087_v47  ;;  %v1085_v54 = vpop.f32.mrb[31].mxu1  ;;  %1640 = vmatpush3.bf16.msra.mxu0 %v1707_v39 }
 0xc0a   :  { %v1538_v55 = vmul.f32 -1.442695, %v1088_v52  ;;  %1641 = vmatprep.subr.bf16.mxu0 %v1823_v17 }
 0xc0b   :  { %1809 = vpow2.f32 %v1537_v36 }
 0xc0c   :  { %1811 = vpow2.f32 %v1538_v55 }
 0xc0d   :  { %1813 = vtanh.f32 %v1088_v52  ;;  %1642 = vmatpush3.bf16.msra.mxu0 %v1708_v62 }
 0xc0e   :  { %1643 = vmatprep.subr.bf16.mxu0 %v1823_v17 }
 0xc11   :  { %1644 = vmatpush3.bf16.msra.mxu0 %v1709_v30 }
 0xc12   :  { %1645 = vmatprep.subr.bf16.mxu0 %v1823_v17  ;;  %v1561_v17 = vld [vmem:[%s2345_s12] ss:$0 sm:$0xff] }
 0xc15   :  { %v1810_v56 = vpop.eup %1809  ;;  %1646 = vmatpush3.bf16.msra.mxu0 %v1710_v18 }
 0xc16   :  { %v1812_v57 = vpop.eup %1811  ;;  %v1092_v58 = vadd.f32 1.0, %v1810_v56  ;;  %v1316_v3 = vpop.f32.mrb[32].mxu1 }
 0xc17   :  { %v1099_v5 = vadd.f32 1.0, %v1812_v57  ;;  %v1637_v59 = vpop.f32.mrb[33].mxu1  ;;  %v1814_v40 = vpop.eup %1813 }
 0xc18   :  { %1815 = vrcp.f32 %v1092_v58  ;;  %v1319_v61 = vpop.f32.mrb[34].mxu1 }
 0xc19   :  { %1817 = vrcp.f32 %v1099_v5  ;;  %v1638_v37 = vpop.f32.mrb[35].mxu1 }
 0xc22   :  { %v1816_v0 = vpop.eup %1815 }
 0xc23   :  { %v1818_v1 = vpop.eup %1817  ;;  %1105 = vrot.lane.b32.xlu0 %v1816_v0, %s1822_s5 }
 0xc24   :  { %v1102_v14 = vsel %vm291_vm2, %v1814_v40, %v1818_v1 }
 0xc25   :  { %v1103_v34 = vmul.f32 %v1816_v0, %v1102_v14 }
 0xc27   :  { %1109 = vrot.lane.b32.xlu0 %v1102_v14, %s1822_s5  ;;  %v1104_v6 = vsel %vm291_vm2, %v1103_v34, 0.0 }
 0xc95   :  { %v1106_v2 = vpop.permute.xlu0 %1105 }
 0xc96   :  { %v1107_v4 = vmul.f32 %v1106_v2, %v2267_v27 }
 0xc98   :  { %v1108_v10 = vadd.f32 %v1107_v4, %v1104_v6 }
 0xc99   :  { %v1110_v13 = vpop.permute.xlu0 %1109 }
 0xc9a   :  { %1819 = vtanh.f32 %v1108_v10 }
 0xca4   :  { %v1820_v12 = vpop.eup %1819 }
 0xca5   :  { %v1112_v15 = vmul.f32 %v1820_v12, %v1110_v13 }
 0xca7   :  { %v1237_v49 = vpack.c.bf16 %v1112_v15, %v1112_v15 }
 0xca9   :  { %1648 = vmatmul.mubr.msk.bf16.vlgmr.msra.gmra.mrb[36].mxu0 %vm356_vm1, %v1237_v49 }
 0xd7c   :  { %v1383_v48 = vpop.f32.mrb[36].mxu0 }
 0xd7d   :  { %v1384_v60 = vadd.f32 %v1383_v48, %v1316_v3  ;;  %v1649_v63 = vpop.f32.mrb[37].mxu0 }
 0xd7e   :  { %v1386_v8 = vpop.f32.mrb[38].mxu0 }
 0xd7f   :  { %v1396_v19 = vadd.f32 %v1560_v51, %v1384_v60  ;;  %v1650_v20 = vpop.f32.mrb[39].mxu0 }
 0xd81   :  { %v1397_v24 = vmax.f32 %v1396_v19, 0.0 }
 0xd83   :  { %v1398_v22 = vpack.c.bf16 %v1397_v24, %v1397_v24 }
 0xd85   :  { %1656 = vmatmul.mubr.msk.bf16.vlgmr.msra.gmra.mrb[36].mxu1 %vm1422_vm4, %v1398_v22 }
 0xe58   :  { %v1460_v23 = vpop.f32.mrb[36].mxu1 }
 0xe59   :  { %v1461_v26 = vadd.f32 %v1561_v17, %v1460_v23  ;;  %v1657_v27 = vpop.f32.mrb[37].mxu1 }
 0xe5a   :  { %v1463_v29 = vpop.f32.mrb[38].mxu1 }
 0xe5b   :  { %1467 = vst.msk [vmem:[%s2346_s13] sm:$0xff] %vm1466_vm5, %v1461_v26  ;;  %v1658_v32 = vpop.f32.mrb[39].mxu1 }

</bundles_post_ra>
